<compile_context>
chip_gen: v7x
topology: tpu7x:2x2x1
jax: 0.10.0
libtpu: 0.0.40
codegen_flags: <defaults>
</compile_context>

<pallas_src>
import jax
import jax.numpy as jnp
from jax import lax
from jax.experimental import pallas as pl
from jax.experimental.pallas import tpu as pltpu

VOCAB_SIZE = 1000
EMB_DIM = 100
EMB_PAD = 128          # lane-aligned padded embedding dim (zero padding -> exact)
HIDDEN_DIM = 128
NUM_DIM = 11


def lstm_fc_kernel(x_ref, num_ref, wih_t_ref, whh_t_ref, b_ref,
                   fcwh_ref, fcwn_ref, fcb_ref, out_ref):
    """Fused LSTM recurrence + final linear layer.

    x_ref:     [T*B, E_PAD]   bf16 time-major embedded inputs (row = t*B + b)
    num_ref:   [B, NUM]       f32 numerical features
    wih_t_ref: [E_PAD, 4H]    bf16, pre-transposed / zero-padded, gate order (i,f,o,g)
    whh_t_ref: [H, 4H]        bf16, pre-transposed, gate order (i,f,o,g)
    b_ref:     [1, 4H]        f32, b_ih + b_hh, gate order (i,f,o,g)
    fcwh_ref:  [1, H], fcwn_ref: [1, NUM], fcb_ref: [1, 1]   (f32)
    out_ref:   [B, 1]         f32
    """
    TB = x_ref.shape[0]
    B = num_ref.shape[0]
    T = TB // B
    H = whh_t_ref.shape[0]

    whh_t = whh_t_ref[...]                                  # bf16 [H, 4H]

    # --- Hoisted input projection: single M = T*B matmul, bias added once.
    # Result (T*B x 4H f32 = 32 KiB = 8 vregs) stays live in vregs; no scratch.
    x_proj = jnp.dot(x_ref[...], wih_t_ref[...],
                     preferred_element_type=jnp.float32) + b_ref[...]   # [T*B, 4H] f32

    # --- Serial LSTM recurrence: only the small h @ W_hh matmul is on the dependency
    # chain. Statically unrolled (T fixed, tiny) so slices below are static.
    h = jnp.zeros((B, H), jnp.float32)
    c = jnp.zeros((B, H), jnp.float32)
    for t in range(T):
        gates = x_proj[t * B:(t + 1) * B, :] + jnp.dot(
            h.astype(whh_t.dtype), whh_t, preferred_element_type=jnp.float32)
        # Permuted gate order (i, f, o, g): one sigmoid over 3H lanes, one tanh over H.
        sig = jax.nn.sigmoid(gates[:, :3 * H])
        i = sig[:, 0 * H:1 * H]
        f = sig[:, 1 * H:2 * H]
        o = sig[:, 2 * H:3 * H]
        g = jnp.tanh(gates[:, 3 * H:])
        c = f * c + i * g
        h = o * jnp.tanh(c)

    # --- Final FC (output width 1): VPU multiply + row reduction, kept in f32.
    out = (jnp.sum(h * fcwh_ref[...], axis=-1, keepdims=True)
           + jnp.sum(num_ref[...] * fcwn_ref[...], axis=-1, keepdims=True)
           + fcb_ref[...])
    out_ref[...] = out


def init_params(key):
    ks = jax.random.split(key, 6)
    scale = 0.05
    return {
        "embedding": scale * jax.random.normal(ks[0], (VOCAB_SIZE, EMB_DIM), jnp.float32),
        "w_ih": scale * jax.random.normal(ks[1], (4 * HIDDEN_DIM, EMB_DIM), jnp.float32),
        "w_hh": scale * jax.random.normal(ks[2], (4 * HIDDEN_DIM, HIDDEN_DIM), jnp.float32),
        "b_ih": scale * jax.random.normal(ks[3], (4 * HIDDEN_DIM,), jnp.float32),
        "b_hh": scale * jax.random.normal(ks[4], (4 * HIDDEN_DIM,), jnp.float32),
        "fc_w": scale * jax.random.normal(ks[5], (1, HIDDEN_DIM + NUM_DIM), jnp.float32),
        "fc_b": jnp.zeros((1,), jnp.float32),
    }


def _permute_gate_cols(w):
    """Reorder gate blocks along the last axis: PyTorch (i,f,g,o) -> kernel (i,f,o,g)."""
    H = HIDDEN_DIM
    return jnp.concatenate([w[..., :2 * H], w[..., 3 * H:4 * H], w[..., 2 * H:3 * H]],
                           axis=-1)


def prepare_params(params):
    """One-time (per-weight-update) layout prep; keeps per-call wrapper glue minimal."""
    wih_t = jnp.pad(params["w_ih"], ((0, 0), (0, EMB_PAD - EMB_DIM))).T   # [E_PAD, 4H]
    whh_t = params["w_hh"].T                                              # [H, 4H]
    b_comb = (params["b_ih"] + params["b_hh"]).reshape(1, 4 * HIDDEN_DIM)
    return {
        "embedding": params["embedding"],                                 # raw [V, E] f32
        "wih_t": _permute_gate_cols(wih_t).astype(jnp.bfloat16),
        "whh_t": _permute_gate_cols(whh_t).astype(jnp.bfloat16),
        "b": _permute_gate_cols(b_comb),                                  # f32
        "fcwh": params["fc_w"][:, :HIDDEN_DIM],                           # [1, H]   f32
        "fcwn": params["fc_w"][:, HIDDEN_DIM:],                           # [1, NUM] f32
        "fcb": params["fc_b"].reshape(1, 1),
    }


def simple_lstm_forward(text, numerical, prep):
    B, T = text.shape

    # Gather on the raw [V, E] table, then pad only the tiny [B,T,E] result to E_PAD.
    x = jnp.take(prep["embedding"], text, axis=0)                   # [B, T, E]
    x = jnp.transpose(x, (1, 0, 2)).reshape(T * B, EMB_DIM)         # row = t*B + b
    x = jnp.pad(x, ((0, 0), (0, EMB_PAD - EMB_DIM))).astype(jnp.bfloat16)

    out = pl.pallas_call(
        lstm_fc_kernel,
        out_shape=jax.ShapeDtypeStruct((B, 1), jnp.float32),
        in_specs=[pl.BlockSpec(memory_space=pltpu.MemorySpace.VMEM)] * 8,
        out_specs=pl.BlockSpec(memory_space=pltpu.MemorySpace.VMEM),
        # Live VMEM is ~0.3 MiB (x 4 KiB, bf16 weights 2*128 KiB, small vectors);
        # 8 MiB fits comfortably on v5e/v6e (128 MiB) and v7x (64 MiB).
        compiler_params=pltpu.CompilerParams(vmem_limit_bytes=8 * 1024 * 1024),
    )(x, numerical.astype(jnp.float32), prep["wih_t"], prep["whh_t"], prep["b"],
      prep["fcwh"], prep["fcwn"], prep["fcb"])
    return out[:, 0]   # == torch .squeeze() for output shape (B, 1)


def reference_forward(text, numerical, params):
    """Pure-JAX f32 reference of the PyTorch forward (for correctness check)."""
    emb = jnp.take(params["embedding"], text, axis=0)      # [B, T, E]
    wih_t = params["w_ih"].T
    whh_t = params["w_hh"].T
    bias = params["b_ih"] + params["b_hh"]
    H = HIDDEN_DIM

    def step(carry, x_t):
        h, c = carry
        gates = x_t @ wih_t + h @ whh_t + bias
        i = jax.nn.sigmoid(gates[:, 0 * H:1 * H])
        f = jax.nn.sigmoid(gates[:, 1 * H:2 * H])
        g = jnp.tanh(gates[:, 2 * H:3 * H])
        o = jax.nn.sigmoid(gates[:, 3 * H:4 * H])
        c_new = f * c + i * g
        h_new = o * jnp.tanh(c_new)
        return (h_new, c_new), None

    B = text.shape[0]
    (h, _), _ = lax.scan(step,
                         (jnp.zeros((B, H), jnp.float32), jnp.zeros((B, H), jnp.float32)),
                         jnp.transpose(emb, (1, 0, 2)))
    combined = jnp.concatenate([h, numerical], axis=1)
    return (combined @ params["fc_w"].T + params["fc_b"])[:, 0]


if __name__ == "__main__":
    BATCH = 2
    SEQ = 8

    key = jax.random.PRNGKey(0)
    k_param, k_text, k_num = jax.random.split(key, 3)

    params = init_params(k_param)
    prep = prepare_params(params)                 # one-time weight layout prep
    text = jax.random.randint(k_text, (BATCH, SEQ), 0, VOCAB_SIZE, dtype=jnp.int32)
    numerical = jax.random.normal(k_num, (BATCH, NUM_DIM), jnp.float32)

    fwd = jax.jit(simple_lstm_forward)
    out = jax.block_until_ready(fwd(text, numerical, prep))

    ref = jax.block_until_ready(reference_forward(text, numerical, params))
    assert out.shape == (BATCH,), out.shape
    # bf16 matmul inputs with f32 accumulation: slightly looser tolerance than pure f32.
    assert jnp.allclose(out, ref, atol=5e-3, rtol=5e-3), (out, ref)

    print("KERNEL_OK")
</pallas_src>

<mosaic_0001>
module attributes {stable_mosaic.version = 11 : i64} {
  func.func @lstm_fc_kernel(%arg0: memref<16x128xbf16, #tpu.memory_space<vmem>>, %arg1: memref<2x11xf32, #tpu.memory_space<vmem>>, %arg2: memref<128x512xbf16, #tpu.memory_space<vmem>>, %arg3: memref<128x512xbf16, #tpu.memory_space<vmem>>, %arg4: memref<1x512xf32, #tpu.memory_space<vmem>>, %arg5: memref<1x128xf32, #tpu.memory_space<vmem>>, %arg6: memref<1x11xf32, #tpu.memory_space<vmem>>, %arg7: memref<1x1xf32, #tpu.memory_space<vmem>>, %arg8: memref<2x1xf32, #tpu.memory_space<vmem>>) attributes {dimension_semantics = [], scalar_prefetch = 0 : i64, scratch_operands = 0 : i64, tpu.core_type = #tpu.core_type<tc>} {
    %c0 = arith.constant 0 : index
    %c0_0 = arith.constant 0 : index
    %0 = vector.load %arg3[%c0, %c0_0] : memref<128x512xbf16, #tpu.memory_space<vmem>>, vector<128x512xbf16>
    %c0_1 = arith.constant 0 : index
    %c0_2 = arith.constant 0 : index
    %1 = vector.load %arg0[%c0_1, %c0_2] : memref<16x128xbf16, #tpu.memory_space<vmem>>, vector<16x128xbf16>
    %c0_3 = arith.constant 0 : index
    %c0_4 = arith.constant 0 : index
    %2 = vector.load %arg2[%c0_3, %c0_4] : memref<128x512xbf16, #tpu.memory_space<vmem>>, vector<128x512xbf16>
    %cst = arith.constant dense<0.000000e+00> : vector<16x512xf32>
    %3 = tpu.matmul %1, %2, %cst {dimension_numbers = #tpu.dot_dimension_numbers<[1], [0], [0], [1], [0, 0, 1, 1], [], []>} : vector<16x128xbf16>, vector<128x512xbf16>, vector<16x512xf32> -> vector<16x512xf32>
    %c0_5 = arith.constant 0 : index
    %c0_6 = arith.constant 0 : index
    %4 = vector.load %arg4[%c0_5, %c0_6] : memref<1x512xf32, #tpu.memory_space<vmem>>, vector<1x512xf32>
    %5 = vector.broadcast %4 : vector<1x512xf32> to vector<16x512xf32>
    %6 = arith.addf %3, %5 : vector<16x512xf32>
    %cst_7 = arith.constant 0.000000e+00 : f32
    %7 = vector.broadcast %cst_7 : f32 to vector<2x128xf32>
    %cst_8 = arith.constant 0.000000e+00 : f32
    %8 = vector.broadcast %cst_8 : f32 to vector<2x128xf32>
    %9 = vector.extract_strided_slice %6 {offsets = [0, 0], sizes = [2, 512], strides = [1, 1]} : vector<16x512xf32> to vector<2x512xf32>
    %10 = arith.truncf %7 : vector<2x128xf32> to vector<2x128xbf16>
    %cst_9 = arith.constant dense<0.000000e+00> : vector<2x512xf32>
    %11 = tpu.matmul %10, %0, %cst_9 {dimension_numbers = #tpu.dot_dimension_numbers<[1], [0], [0], [1], [0, 0, 1, 1], [], []>} : vector<2x128xbf16>, vector<128x512xbf16>, vector<2x512xf32> -> vector<2x512xf32>
    %12 = arith.addf %9, %11 : vector<2x512xf32>
    %13 = vector.extract_strided_slice %12 {offsets = [0, 0], sizes = [2, 384], strides = [1, 1]} : vector<2x512xf32> to vector<2x384xf32>
    %14 = arith.negf %13 : vector<2x384xf32>
    %15 = math.exp %14 : vector<2x384xf32>
    %cst_10 = arith.constant 1.000000e+00 : f32
    %16 = vector.broadcast %cst_10 : f32 to vector<2x384xf32>
    %17 = arith.addf %16, %15 : vector<2x384xf32>
    %18 = arith.divf %16, %17 : vector<2x384xf32>
    %19 = vector.extract_strided_slice %18 {offsets = [0, 0], sizes = [2, 128], strides = [1, 1]} : vector<2x384xf32> to vector<2x128xf32>
    %20 = vector.extract_strided_slice %18 {offsets = [0, 128], sizes = [2, 128], strides = [1, 1]} : vector<2x384xf32> to vector<2x128xf32>
    %21 = vector.extract_strided_slice %18 {offsets = [0, 256], sizes = [2, 128], strides = [1, 1]} : vector<2x384xf32> to vector<2x128xf32>
    %22 = vector.extract_strided_slice %12 {offsets = [0, 384], sizes = [2, 128], strides = [1, 1]} : vector<2x512xf32> to vector<2x128xf32>
    %23 = math.tanh %22 : vector<2x128xf32>
    %24 = arith.mulf %20, %8 : vector<2x128xf32>
    %25 = arith.mulf %19, %23 : vector<2x128xf32>
    %26 = arith.addf %24, %25 : vector<2x128xf32>
    %27 = math.tanh %26 : vector<2x128xf32>
    %28 = arith.mulf %21, %27 : vector<2x128xf32>
    %29 = vector.extract_strided_slice %6 {offsets = [2, 0], sizes = [2, 512], strides = [1, 1]} : vector<16x512xf32> to vector<2x512xf32>
    %30 = arith.truncf %28 : vector<2x128xf32> to vector<2x128xbf16>
    %cst_11 = arith.constant dense<0.000000e+00> : vector<2x512xf32>
    %31 = tpu.matmul %30, %0, %cst_11 {dimension_numbers = #tpu.dot_dimension_numbers<[1], [0], [0], [1], [0, 0, 1, 1], [], []>} : vector<2x128xbf16>, vector<128x512xbf16>, vector<2x512xf32> -> vector<2x512xf32>
    %32 = arith.addf %29, %31 : vector<2x512xf32>
    %33 = vector.extract_strided_slice %32 {offsets = [0, 0], sizes = [2, 384], strides = [1, 1]} : vector<2x512xf32> to vector<2x384xf32>
    %34 = arith.negf %33 : vector<2x384xf32>
    %35 = math.exp %34 : vector<2x384xf32>
    %cst_12 = arith.constant 1.000000e+00 : f32
    %36 = vector.broadcast %cst_12 : f32 to vector<2x384xf32>
    %37 = arith.addf %36, %35 : vector<2x384xf32>
    %38 = arith.divf %36, %37 : vector<2x384xf32>
    %39 = vector.extract_strided_slice %38 {offsets = [0, 0], sizes = [2, 128], strides = [1, 1]} : vector<2x384xf32> to vector<2x128xf32>
    %40 = vector.extract_strided_slice %38 {offsets = [0, 128], sizes = [2, 128], strides = [1, 1]} : vector<2x384xf32> to vector<2x128xf32>
    %41 = vector.extract_strided_slice %38 {offsets = [0, 256], sizes = [2, 128], strides = [1, 1]} : vector<2x384xf32> to vector<2x128xf32>
    %42 = vector.extract_strided_slice %32 {offsets = [0, 384], sizes = [2, 128], strides = [1, 1]} : vector<2x512xf32> to vector<2x128xf32>
    %43 = math.tanh %42 : vector<2x128xf32>
    %44 = arith.mulf %40, %26 : vector<2x128xf32>
    %45 = arith.mulf %39, %43 : vector<2x128xf32>
    %46 = arith.addf %44, %45 : vector<2x128xf32>
    %47 = math.tanh %46 : vector<2x128xf32>
    %48 = arith.mulf %41, %47 : vector<2x128xf32>
    %49 = vector.extract_strided_slice %6 {offsets = [4, 0], sizes = [2, 512], strides = [1, 1]} : vector<16x512xf32> to vector<2x512xf32>
    %50 = arith.truncf %48 : vector<2x128xf32> to vector<2x128xbf16>
    %cst_13 = arith.constant dense<0.000000e+00> : vector<2x512xf32>
    %51 = tpu.matmul %50, %0, %cst_13 {dimension_numbers = #tpu.dot_dimension_numbers<[1], [0], [0], [1], [0, 0, 1, 1], [], []>} : vector<2x128xbf16>, vector<128x512xbf16>, vector<2x512xf32> -> vector<2x512xf32>
    %52 = arith.addf %49, %51 : vector<2x512xf32>
    %53 = vector.extract_strided_slice %52 {offsets = [0, 0], sizes = [2, 384], strides = [1, 1]} : vector<2x512xf32> to vector<2x384xf32>
    %54 = arith.negf %53 : vector<2x384xf32>
    %55 = math.exp %54 : vector<2x384xf32>
    %cst_14 = arith.constant 1.000000e+00 : f32
    %56 = vector.broadcast %cst_14 : f32 to vector<2x384xf32>
    %57 = arith.addf %56, %55 : vector<2x384xf32>
    %58 = arith.divf %56, %57 : vector<2x384xf32>
    %59 = vector.extract_strided_slice %58 {offsets = [0, 0], sizes = [2, 128], strides = [1, 1]} : vector<2x384xf32> to vector<2x128xf32>
    %60 = vector.extract_strided_slice %58 {offsets = [0, 128], sizes = [2, 128], strides = [1, 1]} : vector<2x384xf32> to vector<2x128xf32>
    %61 = vector.extract_strided_slice %58 {offsets = [0, 256], sizes = [2, 128], strides = [1, 1]} : vector<2x384xf32> to vector<2x128xf32>
    %62 = vector.extract_strided_slice %52 {offsets = [0, 384], sizes = [2, 128], strides = [1, 1]} : vector<2x512xf32> to vector<2x128xf32>
    %63 = math.tanh %62 : vector<2x128xf32>
    %64 = arith.mulf %60, %46 : vector<2x128xf32>
    %65 = arith.mulf %59, %63 : vector<2x128xf32>
    %66 = arith.addf %64, %65 : vector<2x128xf32>
    %67 = math.tanh %66 : vector<2x128xf32>
    %68 = arith.mulf %61, %67 : vector<2x128xf32>
    %69 = vector.extract_strided_slice %6 {offsets = [6, 0], sizes = [2, 512], strides = [1, 1]} : vector<16x512xf32> to vector<2x512xf32>
    %70 = arith.truncf %68 : vector<2x128xf32> to vector<2x128xbf16>
    %cst_15 = arith.constant dense<0.000000e+00> : vector<2x512xf32>
    %71 = tpu.matmul %70, %0, %cst_15 {dimension_numbers = #tpu.dot_dimension_numbers<[1], [0], [0], [1], [0, 0, 1, 1], [], []>} : vector<2x128xbf16>, vector<128x512xbf16>, vector<2x512xf32> -> vector<2x512xf32>
    %72 = arith.addf %69, %71 : vector<2x512xf32>
    %73 = vector.extract_strided_slice %72 {offsets = [0, 0], sizes = [2, 384], strides = [1, 1]} : vector<2x512xf32> to vector<2x384xf32>
    %74 = arith.negf %73 : vector<2x384xf32>
    %75 = math.exp %74 : vector<2x384xf32>
    %cst_16 = arith.constant 1.000000e+00 : f32
    %76 = vector.broadcast %cst_16 : f32 to vector<2x384xf32>
    %77 = arith.addf %76, %75 : vector<2x384xf32>
    %78 = arith.divf %76, %77 : vector<2x384xf32>
    %79 = vector.extract_strided_slice %78 {offsets = [0, 0], sizes = [2, 128], strides = [1, 1]} : vector<2x384xf32> to vector<2x128xf32>
    %80 = vector.extract_strided_slice %78 {offsets = [0, 128], sizes = [2, 128], strides = [1, 1]} : vector<2x384xf32> to vector<2x128xf32>
    %81 = vector.extract_strided_slice %78 {offsets = [0, 256], sizes = [2, 128], strides = [1, 1]} : vector<2x384xf32> to vector<2x128xf32>
    %82 = vector.extract_strided_slice %72 {offsets = [0, 384], sizes = [2, 128], strides = [1, 1]} : vector<2x512xf32> to vector<2x128xf32>
    %83 = math.tanh %82 : vector<2x128xf32>
    %84 = arith.mulf %80, %66 : vector<2x128xf32>
    %85 = arith.mulf %79, %83 : vector<2x128xf32>
    %86 = arith.addf %84, %85 : vector<2x128xf32>
    %87 = math.tanh %86 : vector<2x128xf32>
    %88 = arith.mulf %81, %87 : vector<2x128xf32>
    %89 = vector.extract_strided_slice %6 {offsets = [8, 0], sizes = [2, 512], strides = [1, 1]} : vector<16x512xf32> to vector<2x512xf32>
    %90 = arith.truncf %88 : vector<2x128xf32> to vector<2x128xbf16>
    %cst_17 = arith.constant dense<0.000000e+00> : vector<2x512xf32>
    %91 = tpu.matmul %90, %0, %cst_17 {dimension_numbers = #tpu.dot_dimension_numbers<[1], [0], [0], [1], [0, 0, 1, 1], [], []>} : vector<2x128xbf16>, vector<128x512xbf16>, vector<2x512xf32> -> vector<2x512xf32>
    %92 = arith.addf %89, %91 : vector<2x512xf32>
    %93 = vector.extract_strided_slice %92 {offsets = [0, 0], sizes = [2, 384], strides = [1, 1]} : vector<2x512xf32> to vector<2x384xf32>
    %94 = arith.negf %93 : vector<2x384xf32>
    %95 = math.exp %94 : vector<2x384xf32>
    %cst_18 = arith.constant 1.000000e+00 : f32
    %96 = vector.broadcast %cst_18 : f32 to vector<2x384xf32>
    %97 = arith.addf %96, %95 : vector<2x384xf32>
    %98 = arith.divf %96, %97 : vector<2x384xf32>
    %99 = vector.extract_strided_slice %98 {offsets = [0, 0], sizes = [2, 128], strides = [1, 1]} : vector<2x384xf32> to vector<2x128xf32>
    %100 = vector.extract_strided_slice %98 {offsets = [0, 128], sizes = [2, 128], strides = [1, 1]} : vector<2x384xf32> to vector<2x128xf32>
    %101 = vector.extract_strided_slice %98 {offsets = [0, 256], sizes = [2, 128], strides = [1, 1]} : vector<2x384xf32> to vector<2x128xf32>
    %102 = vector.extract_strided_slice %92 {offsets = [0, 384], sizes = [2, 128], strides = [1, 1]} : vector<2x512xf32> to vector<2x128xf32>
    %103 = math.tanh %102 : vector<2x128xf32>
    %104 = arith.mulf %100, %86 : vector<2x128xf32>
    %105 = arith.mulf %99, %103 : vector<2x128xf32>
    %106 = arith.addf %104, %105 : vector<2x128xf32>
    %107 = math.tanh %106 : vector<2x128xf32>
    %108 = arith.mulf %101, %107 : vector<2x128xf32>
    %109 = vector.extract_strided_slice %6 {offsets = [10, 0], sizes = [2, 512], strides = [1, 1]} : vector<16x512xf32> to vector<2x512xf32>
    %110 = arith.truncf %108 : vector<2x128xf32> to vector<2x128xbf16>
    %cst_19 = arith.constant dense<0.000000e+00> : vector<2x512xf32>
    %111 = tpu.matmul %110, %0, %cst_19 {dimension_numbers = #tpu.dot_dimension_numbers<[1], [0], [0], [1], [0, 0, 1, 1], [], []>} : vector<2x128xbf16>, vector<128x512xbf16>, vector<2x512xf32> -> vector<2x512xf32>
    %112 = arith.addf %109, %111 : vector<2x512xf32>
    %113 = vector.extract_strided_slice %112 {offsets = [0, 0], sizes = [2, 384], strides = [1, 1]} : vector<2x512xf32> to vector<2x384xf32>
    %114 = arith.negf %113 : vector<2x384xf32>
    %115 = math.exp %114 : vector<2x384xf32>
    %cst_20 = arith.constant 1.000000e+00 : f32
    %116 = vector.broadcast %cst_20 : f32 to vector<2x384xf32>
    %117 = arith.addf %116, %115 : vector<2x384xf32>
    %118 = arith.divf %116, %117 : vector<2x384xf32>
    %119 = vector.extract_strided_slice %118 {offsets = [0, 0], sizes = [2, 128], strides = [1, 1]} : vector<2x384xf32> to vector<2x128xf32>
    %120 = vector.extract_strided_slice %118 {offsets = [0, 128], sizes = [2, 128], strides = [1, 1]} : vector<2x384xf32> to vector<2x128xf32>
    %121 = vector.extract_strided_slice %118 {offsets = [0, 256], sizes = [2, 128], strides = [1, 1]} : vector<2x384xf32> to vector<2x128xf32>
    %122 = vector.extract_strided_slice %112 {offsets = [0, 384], sizes = [2, 128], strides = [1, 1]} : vector<2x512xf32> to vector<2x128xf32>
    %123 = math.tanh %122 : vector<2x128xf32>
    %124 = arith.mulf %120, %106 : vector<2x128xf32>
    %125 = arith.mulf %119, %123 : vector<2x128xf32>
    %126 = arith.addf %124, %125 : vector<2x128xf32>
    %127 = math.tanh %126 : vector<2x128xf32>
    %128 = arith.mulf %121, %127 : vector<2x128xf32>
    %129 = vector.extract_strided_slice %6 {offsets = [12, 0], sizes = [2, 512], strides = [1, 1]} : vector<16x512xf32> to vector<2x512xf32>
    %130 = arith.truncf %128 : vector<2x128xf32> to vector<2x128xbf16>
    %cst_21 = arith.constant dense<0.000000e+00> : vector<2x512xf32>
    %131 = tpu.matmul %130, %0, %cst_21 {dimension_numbers = #tpu.dot_dimension_numbers<[1], [0], [0], [1], [0, 0, 1, 1], [], []>} : vector<2x128xbf16>, vector<128x512xbf16>, vector<2x512xf32> -> vector<2x512xf32>
    %132 = arith.addf %129, %131 : vector<2x512xf32>
    %133 = vector.extract_strided_slice %132 {offsets = [0, 0], sizes = [2, 384], strides = [1, 1]} : vector<2x512xf32> to vector<2x384xf32>
    %134 = arith.negf %133 : vector<2x384xf32>
    %135 = math.exp %134 : vector<2x384xf32>
    %cst_22 = arith.constant 1.000000e+00 : f32
    %136 = vector.broadcast %cst_22 : f32 to vector<2x384xf32>
    %137 = arith.addf %136, %135 : vector<2x384xf32>
    %138 = arith.divf %136, %137 : vector<2x384xf32>
    %139 = vector.extract_strided_slice %138 {offsets = [0, 0], sizes = [2, 128], strides = [1, 1]} : vector<2x384xf32> to vector<2x128xf32>
    %140 = vector.extract_strided_slice %138 {offsets = [0, 128], sizes = [2, 128], strides = [1, 1]} : vector<2x384xf32> to vector<2x128xf32>
    %141 = vector.extract_strided_slice %138 {offsets = [0, 256], sizes = [2, 128], strides = [1, 1]} : vector<2x384xf32> to vector<2x128xf32>
    %142 = vector.extract_strided_slice %132 {offsets = [0, 384], sizes = [2, 128], strides = [1, 1]} : vector<2x512xf32> to vector<2x128xf32>
    %143 = math.tanh %142 : vector<2x128xf32>
    %144 = arith.mulf %140, %126 : vector<2x128xf32>
    %145 = arith.mulf %139, %143 : vector<2x128xf32>
    %146 = arith.addf %144, %145 : vector<2x128xf32>
    %147 = math.tanh %146 : vector<2x128xf32>
    %148 = arith.mulf %141, %147 : vector<2x128xf32>
    %149 = vector.extract_strided_slice %6 {offsets = [14, 0], sizes = [2, 512], strides = [1, 1]} : vector<16x512xf32> to vector<2x512xf32>
    %150 = arith.truncf %148 : vector<2x128xf32> to vector<2x128xbf16>
    %cst_23 = arith.constant dense<0.000000e+00> : vector<2x512xf32>
    %151 = tpu.matmul %150, %0, %cst_23 {dimension_numbers = #tpu.dot_dimension_numbers<[1], [0], [0], [1], [0, 0, 1, 1], [], []>} : vector<2x128xbf16>, vector<128x512xbf16>, vector<2x512xf32> -> vector<2x512xf32>
    %152 = arith.addf %149, %151 : vector<2x512xf32>
    %153 = vector.extract_strided_slice %152 {offsets = [0, 0], sizes = [2, 384], strides = [1, 1]} : vector<2x512xf32> to vector<2x384xf32>
    %154 = arith.negf %153 : vector<2x384xf32>
    %155 = math.exp %154 : vector<2x384xf32>
    %cst_24 = arith.constant 1.000000e+00 : f32
    %156 = vector.broadcast %cst_24 : f32 to vector<2x384xf32>
    %157 = arith.addf %156, %155 : vector<2x384xf32>
    %158 = arith.divf %156, %157 : vector<2x384xf32>
    %159 = vector.extract_strided_slice %158 {offsets = [0, 0], sizes = [2, 128], strides = [1, 1]} : vector<2x384xf32> to vector<2x128xf32>
    %160 = vector.extract_strided_slice %158 {offsets = [0, 128], sizes = [2, 128], strides = [1, 1]} : vector<2x384xf32> to vector<2x128xf32>
    %161 = vector.extract_strided_slice %158 {offsets = [0, 256], sizes = [2, 128], strides = [1, 1]} : vector<2x384xf32> to vector<2x128xf32>
    %162 = vector.extract_strided_slice %152 {offsets = [0, 384], sizes = [2, 128], strides = [1, 1]} : vector<2x512xf32> to vector<2x128xf32>
    %163 = math.tanh %162 : vector<2x128xf32>
    %164 = arith.mulf %160, %146 : vector<2x128xf32>
    %165 = arith.mulf %159, %163 : vector<2x128xf32>
    %166 = arith.addf %164, %165 : vector<2x128xf32>
    %167 = math.tanh %166 : vector<2x128xf32>
    %168 = arith.mulf %161, %167 : vector<2x128xf32>
    %c0_25 = arith.constant 0 : index
    %c0_26 = arith.constant 0 : index
    %169 = vector.load %arg5[%c0_25, %c0_26] : memref<1x128xf32, #tpu.memory_space<vmem>>, vector<1x128xf32>
    %170 = vector.broadcast %169 : vector<1x128xf32> to vector<2x128xf32>
    %171 = arith.mulf %168, %170 : vector<2x128xf32>
    %cst_27 = arith.constant dense<0.000000e+00> : vector<2xf32>
    %172 = vector.multi_reduction <add>, %171, %cst_27 [1] : vector<2x128xf32> to vector<2xf32>
    %173 = vector.shape_cast %172 : vector<2xf32> to vector<2x1xf32>
    %c0_28 = arith.constant 0 : index
    %c0_29 = arith.constant 0 : index
    %174 = vector.load %arg1[%c0_28, %c0_29] : memref<2x11xf32, #tpu.memory_space<vmem>>, vector<2x11xf32>
    %c0_30 = arith.constant 0 : index
    %c0_31 = arith.constant 0 : index
    %175 = vector.load %arg6[%c0_30, %c0_31] : memref<1x11xf32, #tpu.memory_space<vmem>>, vector<1x11xf32>
    %176 = vector.broadcast %175 : vector<1x11xf32> to vector<2x11xf32>
    %177 = arith.mulf %174, %176 : vector<2x11xf32>
    %cst_32 = arith.constant dense<0.000000e+00> : vector<2xf32>
    %178 = vector.multi_reduction <add>, %177, %cst_32 [1] : vector<2x11xf32> to vector<2xf32>
    %179 = vector.shape_cast %178 : vector<2xf32> to vector<2x1xf32>
    %180 = arith.addf %173, %179 : vector<2x1xf32>
    %c0_33 = arith.constant 0 : index
    %c0_34 = arith.constant 0 : index
    %181 = vector.load %arg7[%c0_33, %c0_34] : memref<1x1xf32, #tpu.memory_space<vmem>>, vector<1x1xf32>
    %182 = vector.broadcast %181 : vector<1x1xf32> to vector<2x1xf32>
    %183 = arith.addf %180, %182 : vector<2x1xf32>
    %c0_35 = arith.constant 0 : index
    %c0_36 = arith.constant 0 : index
    %184 = vector.load %arg8[%c0_35, %c0_36] : memref<2x1xf32, #tpu.memory_space<vmem>>, vector<2x1xf32>
    tpu.vector_store %arg8[%c0_35, %c0_36], %183 {strides = array<i32>} : memref<2x1xf32, #tpu.memory_space<vmem>>, vector<2x1xf32>,
    return
  }
}

</mosaic_0001>

<bundles_post_ra>
// kernel: simple_lstm_forward.1
= control target key start
LH: loop header
LB: loop body
LE: loop exit
PB: predicated region body
PF: predicated region fallthrough
CT: control target
= control target key end

     0   :  { %v1920_v1 = vmov 0   ;;  %vm1548_vm0 = vcmask 82944   ;;  %vm1535_vm1 = vcmask 1047558   ;;  %vm1564_vm2 = vcmask 7174   ;;  %s2655_s2 = inlined_call_operand.vmem [shape: bf16[128,512], index: 2, kind: input, shape index: {}]   ;;  %s2656_s0 = inlined_call_operand.vmem [shape: bf16[16,128], index: 0, kind: input, shape index: {}]   ;;  %s2657_s3 = inlined_call_operand.vmem [shape: bf16[128,512], index: 3, kind: input, shape index: {}]   ;;  %s2658_s4 = inlined_call_operand.vmem [shape: f32[1,512], index: 4, kind: input, shape index: {}]   ;;  %s2659_s1 = inlined_call_operand.vmem [shape: f32[2,11], index: 1, kind: input, shape index: {}]   ;;  %s2660_s6 = inlined_call_operand.vmem [shape: f32[1,11], index: 6, kind: input, shape index: {}]   ;;  %s2661_s7 = inlined_call_operand.<no memory space> [shape: f32[1,1], index: 7, kind: input, shape index: {}]   ;;  %s2662_s5 = inlined_call_operand.vmem [shape: f32[1,128], index: 5, kind: input, shape index: {}]   ;;  %s2663_s8 = inlined_call_operand.vmem [shape: f32[2,1], index: 8, kind: output, shape index: {}]  }
   0x1   :  { %v1663_v0 = vld [vmem:[%s2655_s2 + $0x4] ss:$16 sps:$4 sm:$0xff]   ;;  %318 = vmatprep.mubr.bf16.mxu0 %v1920_v1  ;;  %361 = vmatprep.mubr.bf16.mxu1 %v1920_v1  ;;  %v1665_v2 = vld [vmem:[%s2655_s2 + $0xc] ss:$16 sps:$4 sm:$0xff]   ;;  %v1667_v3 = vld [vmem:[%s2655_s2] ss:$16 sps:$4 sm:$0xff]  }
   0x2   :  { %286 = vmatprep.subr.bf16.mxu0 %v1663_v0  ;;  %v1668_v4 = vld [vmem:[%s2655_s2 + $0x8] ss:$16 sps:$4 sm:$0xff]   ;;  %329 = vmatprep.subr.bf16.mxu1 %v1665_v2  ;;  %v1669_v5 = vld [vmem:[%s2655_s2 + $0x24] ss:$16 sps:$4 sm:$0xff]   ;;  %v1671_v6 = vld [vmem:[%s2655_s2 + $0x2c] ss:$16 sps:$4 sm:$0xff]  }
   0x3   :  { %287 = vmatpush1.bf16.msra.mxu0 %v1667_v3  ;;  %330 = vmatpush1.bf16.msra.mxu1 %v1668_v4  ;;  %v1673_v7 = vld [vmem:[%s2655_s2 + $0x20] ss:$16 sps:$4 sm:$0xff]   ;;  %v1674_v8 = vld [vmem:[%s2655_s2 + $0x28] ss:$16 sps:$4 sm:$0xff]   ;;  %v1675_v9 = vld [vmem:[%s2655_s2 + $0x44] ss:$16 sps:$4 sm:$0xff]   ;;  %v100_v3 = vlaneseq }
   0x4   :  { %288 = vmatprep.subr.bf16.mxu0 %v1669_v5  ;;  %331 = vmatprep.subr.bf16.mxu1 %v1671_v6  ;;  %v1677_v10 = vld [vmem:[%s2655_s2 + $0x4c] ss:$16 sps:$4 sm:$0xff]   ;;  %v1679_v11 = vld [vmem:[%s2655_s2 + $0x40] ss:$16 sps:$4 sm:$0xff]   ;;  %v1680_v12 = vld [vmem:[%s2655_s2 + $0x48] ss:$16 sps:$4 sm:$0xff]  }
   0x5   :  { %v1681_v13 = vld [vmem:[%s2655_s2 + $0x64] ss:$16 sps:$4 sm:$0xff]   ;;  %v1683_v14 = vld [vmem:[%s2655_s2 + $0x6c] ss:$16 sps:$4 sm:$0xff]   ;;  %v1685_v15 = vld [vmem:[%s2655_s2 + $0x60] ss:$16 sps:$4 sm:$0xff]  }
   0x6   :  { %v1686_v16 = vld [vmem:[%s2655_s2 + $0x68] ss:$16 sps:$4 sm:$0xff]   ;;  %v1687_v17 = vld [vmem:[%s2655_s2 + $0x84] ss:$16 sps:$4 sm:$0xff]   ;;  %v1689_v18 = vld [vmem:[%s2655_s2 + $0x8c] ss:$16 sps:$4 sm:$0xff]  }
   0x7   :  { %289 = vmatpush1.bf16.msra.mxu0 %v1673_v7  ;;  %332 = vmatpush1.bf16.msra.mxu1 %v1674_v8  ;;  %v1691_v19 = vld [vmem:[%s2655_s2 + $0x80] ss:$16 sps:$4 sm:$0xff]   ;;  %v1692_v20 = vld [vmem:[%s2655_s2 + $0x88] ss:$16 sps:$4 sm:$0xff]   ;;  %v1693_v21 = vld [vmem:[%s2655_s2 + $0xa4] ss:$16 sps:$4 sm:$0xff]  }
   0x8   :  { %290 = vmatprep.subr.bf16.mxu0 %v1675_v9  ;;  %333 = vmatprep.subr.bf16.mxu1 %v1677_v10  ;;  %v1695_v22 = vld [vmem:[%s2655_s2 + $0xac] ss:$16 sps:$4 sm:$0xff]   ;;  %v1697_v23 = vld [vmem:[%s2655_s2 + $0xa0] ss:$16 sps:$4 sm:$0xff]   ;;  %v1698_v24 = vld [vmem:[%s2655_s2 + $0xa8] ss:$16 sps:$4 sm:$0xff]  }
   0x9   :  { %v1699_v25 = vld [vmem:[%s2655_s2 + $0xc4] ss:$16 sps:$4 sm:$0xff]   ;;  %v1701_v26 = vld [vmem:[%s2655_s2 + $0xcc] ss:$16 sps:$4 sm:$0xff]   ;;  %v1703_v27 = vld [vmem:[%s2655_s2 + $0xc0] ss:$16 sps:$4 sm:$0xff]  }
   0xa   :  { %v1704_v28 = vld [vmem:[%s2655_s2 + $0xc8] ss:$16 sps:$4 sm:$0xff]   ;;  %v1705_v29 = vld [vmem:[%s2655_s2 + $0xe4] ss:$16 sps:$4 sm:$0xff]   ;;  %v1707_v30 = vld [vmem:[%s2655_s2 + $0xec] ss:$16 sps:$4 sm:$0xff]  }
   0xb   :  { %291 = vmatpush1.bf16.msra.mxu0 %v1679_v11  ;;  %334 = vmatpush1.bf16.msra.mxu1 %v1680_v12  ;;  %v1709_v31 = vld [vmem:[%s2655_s2 + $0xe0] ss:$16 sps:$4 sm:$0xff]   ;;  %v1710_v32 = vld [vmem:[%s2655_s2 + $0xe8] ss:$16 sps:$4 sm:$0xff]   ;;  %v2067_v33 = vld [vmem:[%s2657_s3 + $0x4] ss:$16 sps:$4 sm:$0xff]  }
   0xc   :  { %292 = vmatprep.subr.bf16.mxu0 %v1681_v13  ;;  %335 = vmatprep.subr.bf16.mxu1 %v1683_v14  ;;  %v2072_v34 = vld [vmem:[%s2657_s3 + $0xc] ss:$16 sps:$4 sm:$0xff]   ;;  %v1711_v35 = vld [vmem:[%s2656_s0] sm:$0xff]   ;;  %v2085_v37 = vld [vmem:[%s2657_s3 + $0x8] ss:$16 sps:$4 sm:$0xff]   ;;  %v101_v4 = vshrl.u32 %v100_v3, 7 }
   0xd   :  { %v2080_v36 = vld [vmem:[%s2657_s3] ss:$16 sps:$4 sm:$0xff]   ;;  %v2090_v38 = vld [vmem:[%s2657_s3 + $0x24] ss:$16 sps:$4 sm:$0xff]   ;;  %v2097_v39 = vld [vmem:[%s2657_s3 + $0x2c] ss:$16 sps:$4 sm:$0xff]  }
   0xe   :  { %v2102_v40 = vld [vmem:[%s2657_s3 + $0x20] ss:$16 sps:$4 sm:$0xff]   ;;  %v2109_v41 = vld [vmem:[%s2657_s3 + $0x28] ss:$16 sps:$4 sm:$0xff]   ;;  %v2116_v42 = vld [vmem:[%s2657_s3 + $0x44] ss:$16 sps:$4 sm:$0xff]  }
   0xf   :  { %293 = vmatpush1.bf16.msra.mxu0 %v1685_v15  ;;  %336 = vmatpush1.bf16.msra.mxu1 %v1686_v16  ;;  %v2121_v43 = vld [vmem:[%s2657_s3 + $0x4c] ss:$16 sps:$4 sm:$0xff]   ;;  %v2130_v44 = vld [vmem:[%s2657_s3 + $0x40] ss:$16 sps:$4 sm:$0xff]   ;;  %v2135_v45 = vld [vmem:[%s2657_s3 + $0x48] ss:$16 sps:$4 sm:$0xff]  }
  0x10   :  { %294 = vmatprep.subr.bf16.mxu0 %v1687_v17  ;;  %337 = vmatprep.subr.bf16.mxu1 %v1689_v18  ;;  %v2140_v46 = vld [vmem:[%s2657_s3 + $0x64] ss:$16 sps:$4 sm:$0xff]   ;;  %v2147_v47 = vld [vmem:[%s2657_s3 + $0x6c] ss:$16 sps:$4 sm:$0xff]   ;;  %v2154_v48 = vld [vmem:[%s2657_s3 + $0x60] ss:$16 sps:$4 sm:$0xff]  }
  0x11   :  { %v2159_v49 = vld [vmem:[%s2657_s3 + $0x68] ss:$16 sps:$4 sm:$0xff]   ;;  %v2166_v50 = vld [vmem:[%s2657_s3 + $0x84] ss:$16 sps:$4 sm:$0xff]   ;;  %v2171_v51 = vld [vmem:[%s2657_s3 + $0x8c] ss:$16 sps:$4 sm:$0xff]  }
  0x12   :  { %v2178_v52 = vld [vmem:[%s2657_s3 + $0x80] ss:$16 sps:$4 sm:$0xff]   ;;  %v2183_v53 = vld [vmem:[%s2657_s3 + $0x88] ss:$16 sps:$4 sm:$0xff]   ;;  %v2190_v54 = vld [vmem:[%s2657_s3 + $0xa4] ss:$16 sps:$4 sm:$0xff]  }
  0x13   :  { %295 = vmatpush1.bf16.msra.mxu0 %v1691_v19  ;;  %338 = vmatpush1.bf16.msra.mxu1 %v1692_v20  ;;  %v2195_v55 = vld [vmem:[%s2657_s3 + $0xac] ss:$16 sps:$4 sm:$0xff]   ;;  %v2202_v56 = vld [vmem:[%s2657_s3 + $0xa0] ss:$16 sps:$4 sm:$0xff]   ;;  %v2207_v57 = vld [vmem:[%s2657_s3 + $0xa8] ss:$16 sps:$4 sm:$0xff]  }
  0x14   :  { %296 = vmatprep.subr.bf16.mxu0 %v1693_v21  ;;  %339 = vmatprep.subr.bf16.mxu1 %v1695_v22  ;;  %v2214_v58 = vld [vmem:[%s2657_s3 + $0xc4] ss:$16 sps:$4 sm:$0xff]   ;;  %v2219_v59 = vld [vmem:[%s2657_s3 + $0xcc] ss:$16 sps:$4 sm:$0xff]   ;;  %v2226_v60 = vld [vmem:[%s2657_s3 + $0xc0] ss:$16 sps:$4 sm:$0xff]  }
  0x15   :  { %v2231_v61 = vld [vmem:[%s2657_s3 + $0xc8] ss:$16 sps:$4 sm:$0xff]   ;;  %v2238_v62 = vld [vmem:[%s2657_s3 + $0xe4] ss:$16 sps:$4 sm:$0xff]   ;;  %v2243_v63 = vld [vmem:[%s2657_s3 + $0xec] ss:$16 sps:$4 sm:$0xff]  }
  0x16   :  { %v2250_v0 = vld [vmem:[%s2657_s3 + $0xe0] ss:$16 sps:$4 sm:$0xff]   ;;  %v2255_v2 = vld [vmem:[%s2657_s3 + $0xe8] ss:$16 sps:$4 sm:$0xff]   ;;  %v102_v5 = vsub.s32 0, %v101_v4  ;;  %v110_v6 = vsub.s32 2, %v101_v4 }
  0x17   :  { %297 = vmatpush1.bf16.msra.mxu0 %v1697_v23  ;;  %340 = vmatpush1.bf16.msra.mxu1 %v1698_v24  ;;  %v98_v7 = vld [vmem:[%s2658_s4] sm:$0xf]  ;;  %v114_v8 = vsub.s32 3, %v101_v4  ;;  %v106_v9 = vsub.s32 1, %v101_v4 }
  0x18   :  { %298 = vmatprep.subr.bf16.mxu0 %v1699_v25  ;;  %341 = vmatprep.subr.bf16.mxu1 %v1701_v26  ;;  %v103_v10 = vrot.slane %v98_v7, %v102_v5  ;;  %v111_v11 = vrot.slane %v98_v7, %v110_v6 }
  0x19   :  { %v115_v14 = vrot.slane %v98_v7, %v114_v8  ;;  %v107_v17 = vrot.slane %v98_v7, %v106_v9 }
  0x1b   :  { %299 = vmatpush1.bf16.msra.mxu0 %v1703_v27  ;;  %342 = vmatpush1.bf16.msra.mxu1 %v1704_v28 }
  0x1c   :  { %300 = vmatprep.subr.bf16.mxu0 %v1705_v29  ;;  %343 = vmatprep.subr.bf16.mxu1 %v1707_v30 }
  0x1f   :  { %301 = vmatpush1.bf16.msra.mxu0 %v1709_v31  ;;  %344 = vmatpush1.bf16.msra.mxu1 %v1710_v32 }
  0x20   :  { %532 = vmatprep.subr.bf16.mxu0 %v2067_v33  ;;  %573 = vmatprep.subr.bf16.mxu1 %v2072_v34 }
  0x22   :  { %319 = vmatmul.mubr.bf16.vlgmr.msra.gmra.mrb[0].mxu0 %v1711_v35  ;;  %362 = vmatmul.mubr.bf16.vlgmr.msra.gmra.mrb[0].mxu1 %v1711_v35 }
  0x23   :  { %533 = vmatpush1.bf16.msra.mxu0 %v2080_v36  ;;  %574 = vmatpush1.bf16.msra.mxu1 %v2085_v37 }
  0x24   :  { %534 = vmatprep.subr.bf16.mxu0 %v2090_v38  ;;  %575 = vmatprep.subr.bf16.mxu1 %v2097_v39 }
  0x25   :  { %564 = vmatprep.mubr.bf16.mxu0 %v1920_v1  ;;  %605 = vmatprep.mubr.bf16.mxu1 %v1920_v1 }
  0x27   :  { %535 = vmatpush1.bf16.msra.mxu0 %v2102_v40  ;;  %576 = vmatpush1.bf16.msra.mxu1 %v2109_v41 }
  0x28   :  { %536 = vmatprep.subr.bf16.mxu0 %v2116_v42  ;;  %577 = vmatprep.subr.bf16.mxu1 %v2121_v43 }
  0x2b   :  { %537 = vmatpush1.bf16.msra.mxu0 %v2130_v44  ;;  %578 = vmatpush1.bf16.msra.mxu1 %v2135_v45 }
  0x2c   :  { %538 = vmatprep.subr.bf16.mxu0 %v2140_v46  ;;  %579 = vmatprep.subr.bf16.mxu1 %v2147_v47 }
  0x2f   :  { %539 = vmatpush1.bf16.msra.mxu0 %v2154_v48  ;;  %580 = vmatpush1.bf16.msra.mxu1 %v2159_v49 }
  0x30   :  { %540 = vmatprep.subr.bf16.mxu0 %v2166_v50  ;;  %581 = vmatprep.subr.bf16.mxu1 %v2171_v51 }
  0x33   :  { %541 = vmatpush1.bf16.msra.mxu0 %v2178_v52  ;;  %582 = vmatpush1.bf16.msra.mxu1 %v2183_v53 }
  0x34   :  { %542 = vmatprep.subr.bf16.mxu0 %v2190_v54  ;;  %583 = vmatprep.subr.bf16.mxu1 %v2195_v55 }
  0x37   :  { %543 = vmatpush1.bf16.msra.mxu0 %v2202_v56  ;;  %584 = vmatpush1.bf16.msra.mxu1 %v2207_v57 }
  0x38   :  { %544 = vmatprep.subr.bf16.mxu0 %v2214_v58  ;;  %585 = vmatprep.subr.bf16.mxu1 %v2219_v59 }
  0x3b   :  { %545 = vmatpush1.bf16.msra.mxu0 %v2226_v60  ;;  %586 = vmatpush1.bf16.msra.mxu1 %v2231_v61 }
  0x3c   :  { %546 = vmatprep.subr.bf16.mxu0 %v2238_v62  ;;  %587 = vmatprep.subr.bf16.mxu1 %v2243_v63 }
  0x3f   :  { %547 = vmatpush1.bf16.msra.mxu0 %v2250_v0  ;;  %588 = vmatpush1.bf16.msra.mxu1 %v2255_v2 }
  0x40   :  { %643 = vmatprep.subr.bf16.mxu0 %v2067_v33  ;;  %684 = vmatprep.subr.bf16.mxu1 %v2072_v34 }
  0x42   :  { %565 = vmatmul.mubr.bf16.vlgmr.msra.gmra.mrb[4].mxu0 %v1920_v1  ;;  %606 = vmatmul.mubr.bf16.vlgmr.msra.gmra.mrb[4].mxu1 %v1920_v1 }
  0x43   :  { %644 = vmatpush1.bf16.msra.mxu0 %v2080_v36  ;;  %685 = vmatpush1.bf16.msra.mxu1 %v2085_v37 }
  0x44   :  { %645 = vmatprep.subr.bf16.mxu0 %v2090_v38  ;;  %686 = vmatprep.subr.bf16.mxu1 %v2097_v39 }
  0x45   :  { %675 = vmatprep.mubr.bf16.mxu0 %v1920_v1  ;;  %716 = vmatprep.mubr.bf16.mxu1 %v1920_v1 }
  0x47   :  { %646 = vmatpush1.bf16.msra.mxu0 %v2102_v40  ;;  %687 = vmatpush1.bf16.msra.mxu1 %v2109_v41 }
  0x48   :  { %647 = vmatprep.subr.bf16.mxu0 %v2116_v42  ;;  %688 = vmatprep.subr.bf16.mxu1 %v2121_v43 }
  0x4b   :  { %648 = vmatpush1.bf16.msra.mxu0 %v2130_v44  ;;  %689 = vmatpush1.bf16.msra.mxu1 %v2135_v45 }
  0x4c   :  { %649 = vmatprep.subr.bf16.mxu0 %v2140_v46  ;;  %690 = vmatprep.subr.bf16.mxu1 %v2147_v47 }
  0x4f   :  { %650 = vmatpush1.bf16.msra.mxu0 %v2154_v48  ;;  %691 = vmatpush1.bf16.msra.mxu1 %v2159_v49 }
  0x50   :  { %651 = vmatprep.subr.bf16.mxu0 %v2166_v50  ;;  %692 = vmatprep.subr.bf16.mxu1 %v2171_v51 }
  0x53   :  { %652 = vmatpush1.bf16.msra.mxu0 %v2178_v52  ;;  %693 = vmatpush1.bf16.msra.mxu1 %v2183_v53 }
  0x54   :  { %653 = vmatprep.subr.bf16.mxu0 %v2190_v54  ;;  %694 = vmatprep.subr.bf16.mxu1 %v2195_v55 }
  0x57   :  { %654 = vmatpush1.bf16.msra.mxu0 %v2202_v56  ;;  %695 = vmatpush1.bf16.msra.mxu1 %v2207_v57 }
  0x58   :  { %655 = vmatprep.subr.bf16.mxu0 %v2214_v58  ;;  %696 = vmatprep.subr.bf16.mxu1 %v2219_v59 }
  0x5b   :  { %656 = vmatpush1.bf16.msra.mxu0 %v2226_v60  ;;  %697 = vmatpush1.bf16.msra.mxu1 %v2231_v61 }
  0x5c   :  { %657 = vmatprep.subr.bf16.mxu0 %v2238_v62  ;;  %698 = vmatprep.subr.bf16.mxu1 %v2243_v63 }
  0x5f   :  { %658 = vmatpush1.bf16.msra.mxu0 %v2250_v0  ;;  %699 = vmatpush1.bf16.msra.mxu1 %v2255_v2 }
  0x60   :  { %772 = vmatprep.subr.bf16.mxu0 %v2067_v33  ;;  %813 = vmatprep.subr.bf16.mxu1 %v2072_v34 }
  0xf5   :  { %v320_v12 = vpop.f32.mrb[0].mxu0  ;;  %v363_v13 = vpop.f32.mrb[0].mxu1 }
  0xf6   :  { %v322_v15 = vpop.f32.mrb[1].mxu0  ;;  %v365_v16 = vpop.f32.mrb[1].mxu1  ;;  %v2310_v26 = vadd.f32 %v320_v12, %v103_v10  ;;  %v2316_v9 = vadd.f32 %v363_v13, %v111_v11 }
  0xf7   :  { %v324_v18 = vpop.f32.mrb[2].mxu0  ;;  %v367_v19 = vpop.f32.mrb[2].mxu1  ;;  %v2312_v27 = vadd.f32 %v322_v15, %v107_v17  ;;  %v2319_v12 = vadd.f32 %v365_v16, %v115_v14 }
  0xf8   :  { %v2302_v20 = vadd.f32 %v324_v18, %v103_v10  ;;  %v326_v21 = vpop.f32.mrb[3].mxu0  ;;  %v2304_v22 = vadd.f32 %v367_v19, %v111_v11  ;;  %v369_v23 = vpop.f32.mrb[3].mxu1 }
  0xf9   :  { %v2306_v24 = vadd.f32 %v326_v21, %v107_v17  ;;  %v2308_v25 = vadd.f32 %v369_v23, %v115_v14 }
 0x115   :  { %v566_v28 = vpop.f32.mrb[4].mxu0  ;;  %v607_v29 = vpop.f32.mrb[4].mxu1 }
 0x116   :  { %v614_v30 = vadd.f32 %v566_v28, %v2310_v26  ;;  %v568_v31 = vpop.f32.mrb[5].mxu0  ;;  %v609_v32 = vpop.f32.mrb[5].mxu1  ;;  %v616_v10 = vadd.f32 %v607_v29, %v2316_v9 }
 0x117   :  { %v615_v35 = vadd.f32 %v568_v31, %v2312_v27  ;;  %v570_v3 = vpop.f32.mrb[6].mxu0  ;;  %v611_v4 = vpop.f32.mrb[6].mxu1  ;;  %v617_v15 = vadd.f32 %v609_v32, %v2319_v12 }
 0x118   :  { %v1635_v5 = vmul.f32 -1.442695, %v614_v30  ;;  %v571_v6 = vpop.f32.mrb[7].mxu0  ;;  %v612_v7 = vpop.f32.mrb[7].mxu1  ;;  %v1637_v17 = vmul.f32 -1.442695, %v616_v10 }
 0x119   :  { %v1636_v8 = vmul.f32 -1.442695, %v615_v35 }
 0x11a   :  { %1760 = vpow2.f32 %v1635_v5 }
 0x11b   :  { %1762 = vpow2.f32 %v1636_v8 }
 0x11c   :  { %1764 = vtanh.f32 %v617_v15 }
 0x11d   :  { %1766 = vpow2.f32 %v1637_v17 }
 0x124   :  { %v1761_v18 = vpop.eup %1760 }
 0x125   :  { %v627_v19 = vadd.f32 1.0, %v1761_v18  ;;  %v1763_v21 = vpop.eup %1762 }
 0x126   :  { %v628_v23 = vadd.f32 1.0, %v1763_v21  ;;  %v1765_v28 = vpop.eup %1764 }
 0x127   :  { %1768 = vrcp.f32 %v627_v19  ;;  %v1767_v30 = vpop.eup %1766 }
 0x128   :  { %1770 = vrcp.f32 %v628_v23  ;;  %v629_v35 = vadd.f32 1.0, %v1767_v30 }
 0x12a   :  { %1772 = vrcp.f32 %v629_v35 }
 0x131   :  { %v1769_v11 = vpop.eup %1768 }
 0x132   :  { %v638_v13 = vmul.f32 %v1769_v11, %v1765_v28  ;;  %v1771_v31 = vpop.eup %1770 }
 0x133   :  { %v637_v29 = vmul.f32 0.0, %v1771_v31 }
 0x134   :  { %v1773_v16 = vpop.eup %1772 }
 0x135   :  { %v2322_v14 = vadd.f32 %v638_v13, %v637_v29 }
 0x137   :  { %1774 = vtanh.f32 %v2322_v14 }
 0x141   :  { %v1775_v32 = vpop.eup %1774 }
 0x142   :  { %v641_v3 = vmul.f32 %v1775_v32, %v1773_v16 }
 0x144   :  { %v642_v4 = vpack.c.bf16 %v641_v3, %v641_v3 }
 0x146   :  { %676 = vmatmul.mubr.bf16.vlgmr.msra.gmra.mrb[8].mxu0 %v642_v4  ;;  %717 = vmatmul.mubr.bf16.vlgmr.msra.gmra.mrb[8].mxu1 %v642_v4 }
 0x147   :  { %773 = vmatpush1.bf16.msra.mxu0 %v2080_v36  ;;  %814 = vmatpush1.bf16.msra.mxu1 %v2085_v37 }
 0x148   :  { %774 = vmatprep.subr.bf16.mxu0 %v2090_v38  ;;  %815 = vmatprep.subr.bf16.mxu1 %v2097_v39 }
 0x149   :  { %804 = vmatprep.mubr.bf16.mxu0 %v1920_v1  ;;  %845 = vmatprep.mubr.bf16.mxu1 %v1920_v1 }
 0x14b   :  { %775 = vmatpush1.bf16.msra.mxu0 %v2102_v40  ;;  %816 = vmatpush1.bf16.msra.mxu1 %v2109_v41 }
 0x14c   :  { %776 = vmatprep.subr.bf16.mxu0 %v2116_v42  ;;  %817 = vmatprep.subr.bf16.mxu1 %v2121_v43 }
 0x14f   :  { %777 = vmatpush1.bf16.msra.mxu0 %v2130_v44  ;;  %818 = vmatpush1.bf16.msra.mxu1 %v2135_v45 }
 0x150   :  { %778 = vmatprep.subr.bf16.mxu0 %v2140_v46  ;;  %819 = vmatprep.subr.bf16.mxu1 %v2147_v47 }
 0x153   :  { %779 = vmatpush1.bf16.msra.mxu0 %v2154_v48  ;;  %820 = vmatpush1.bf16.msra.mxu1 %v2159_v49 }
 0x154   :  { %780 = vmatprep.subr.bf16.mxu0 %v2166_v50  ;;  %821 = vmatprep.subr.bf16.mxu1 %v2171_v51 }
 0x157   :  { %781 = vmatpush1.bf16.msra.mxu0 %v2178_v52  ;;  %822 = vmatpush1.bf16.msra.mxu1 %v2183_v53 }
 0x158   :  { %782 = vmatprep.subr.bf16.mxu0 %v2190_v54  ;;  %823 = vmatprep.subr.bf16.mxu1 %v2195_v55 }
 0x15b   :  { %783 = vmatpush1.bf16.msra.mxu0 %v2202_v56  ;;  %824 = vmatpush1.bf16.msra.mxu1 %v2207_v57 }
 0x15c   :  { %784 = vmatprep.subr.bf16.mxu0 %v2214_v58  ;;  %825 = vmatprep.subr.bf16.mxu1 %v2219_v59 }
 0x15f   :  { %785 = vmatpush1.bf16.msra.mxu0 %v2226_v60  ;;  %826 = vmatpush1.bf16.msra.mxu1 %v2231_v61 }
 0x160   :  { %786 = vmatprep.subr.bf16.mxu0 %v2238_v62  ;;  %827 = vmatprep.subr.bf16.mxu1 %v2243_v63 }
 0x163   :  { %787 = vmatpush1.bf16.msra.mxu0 %v2250_v0  ;;  %828 = vmatpush1.bf16.msra.mxu1 %v2255_v2 }
 0x164   :  { %901 = vmatprep.subr.bf16.mxu0 %v2067_v33  ;;  %942 = vmatprep.subr.bf16.mxu1 %v2072_v34 }
 0x219   :  { %v677_v5 = vpop.f32.mrb[8].mxu0  ;;  %v718_v6 = vpop.f32.mrb[8].mxu1 }
 0x21a   :  { %v729_v7 = vrot.slane %v677_v5, 6  ;;  %v679_v8 = vpop.f32.mrb[9].mxu0  ;;  %v720_v10 = vpop.f32.mrb[9].mxu1  ;;  %v731_v13 = vrot.slane %v718_v6, 6  ;;  %v761_v6 = vrot.slane %v2322_v14, 6 }
 0x21b   :  { %v730_v15 = vrot.slane %v679_v8, 6  ;;  %v681_v17 = vpop.f32.mrb[10].mxu0  ;;  %v722_v18 = vpop.f32.mrb[10].mxu1  ;;  %v732_v31 = vrot.slane %v720_v10, 6 }
 0x21c   :  { %v737_v19 = vadd.f32 %v729_v7, %v2310_v26  ;;  %v682_v21 = vpop.f32.mrb[11].mxu0  ;;  %v723_v23 = vpop.f32.mrb[11].mxu1  ;;  %v739_v35 = vadd.f32 %v731_v13, %v2316_v9 }
 0x21d   :  { %v738_v28 = vadd.f32 %v730_v15, %v2312_v27  ;;  %v740_v29 = vadd.f32 %v732_v31, %v2319_v12 }
 0x21e   :  { %v1638_v30 = vmul.f32 -1.442695, %v737_v19  ;;  %v1640_v16 = vmul.f32 -1.442695, %v739_v35 }
 0x21f   :  { %v1639_v11 = vmul.f32 -1.442695, %v738_v28 }
 0x220   :  { %1776 = vpow2.f32 %v1638_v30 }
 0x221   :  { %1778 = vpow2.f32 %v1639_v11 }
 0x222   :  { %1780 = vtanh.f32 %v740_v29 }
 0x223   :  { %1782 = vpow2.f32 %v1640_v16 }
 0x22a   :  { %v1777_v32 = vpop.eup %1776 }
 0x22b   :  { %v750_v3 = vadd.f32 1.0, %v1777_v32  ;;  %v1779_v4 = vpop.eup %1778 }
 0x22c   :  { %v751_v5 = vadd.f32 1.0, %v1779_v4  ;;  %v1781_v7 = vpop.eup %1780 }
 0x22d   :  { %1784 = vrcp.f32 %v750_v3  ;;  %v1783_v8 = vpop.eup %1782 }
 0x22e   :  { %1786 = vrcp.f32 %v751_v5  ;;  %v752_v18 = vadd.f32 1.0, %v1783_v8 }
 0x230   :  { %1788 = vrcp.f32 %v752_v18 }
 0x237   :  { %v1785_v15 = vpop.eup %1784 }
 0x238   :  { %v764_v17 = vmul.f32 %v1785_v15, %v1781_v7  ;;  %v1787_v10 = vpop.eup %1786 }
 0x239   :  { %v763_v19 = vmul.f32 %v1787_v10, %v761_v6 }
 0x23a   :  { %v1789_v23 = vpop.eup %1788 }
 0x23b   :  { %v2364_v21 = vadd.f32 %v764_v17, %v763_v19 }
 0x23d   :  { %1790 = vtanh.f32 %v2364_v21 }
 0x247   :  { %v1791_v28 = vpop.eup %1790 }
 0x248   :  { %v767_v30 = vmul.f32 %v1791_v28, %v1789_v23 }
 0x24a   :  { %v768_v11 = vpack.c.bf16 %v767_v30, %v767_v30 }
 0x24c   :  { %v770_v13 = vrot.slane %v768_v11, 1 }
 0x24e   :  { %805 = vmatmul.mubr.bf16.vlgmr.msra.gmra.mrb[12].mxu0 %v770_v13  ;;  %846 = vmatmul.mubr.bf16.vlgmr.msra.gmra.mrb[12].mxu1 %v770_v13 }
 0x24f   :  { %902 = vmatpush1.bf16.msra.mxu0 %v2080_v36  ;;  %943 = vmatpush1.bf16.msra.mxu1 %v2085_v37 }
 0x250   :  { %903 = vmatprep.subr.bf16.mxu0 %v2090_v38  ;;  %944 = vmatprep.subr.bf16.mxu1 %v2097_v39 }
 0x251   :  { %933 = vmatprep.mubr.bf16.mxu0 %v1920_v1  ;;  %974 = vmatprep.mubr.bf16.mxu1 %v1920_v1 }
 0x253   :  { %904 = vmatpush1.bf16.msra.mxu0 %v2102_v40  ;;  %945 = vmatpush1.bf16.msra.mxu1 %v2109_v41 }
 0x254   :  { %905 = vmatprep.subr.bf16.mxu0 %v2116_v42  ;;  %946 = vmatprep.subr.bf16.mxu1 %v2121_v43 }
 0x257   :  { %906 = vmatpush1.bf16.msra.mxu0 %v2130_v44  ;;  %947 = vmatpush1.bf16.msra.mxu1 %v2135_v45 }
 0x258   :  { %907 = vmatprep.subr.bf16.mxu0 %v2140_v46  ;;  %948 = vmatprep.subr.bf16.mxu1 %v2147_v47 }
 0x25b   :  { %908 = vmatpush1.bf16.msra.mxu0 %v2154_v48  ;;  %949 = vmatpush1.bf16.msra.mxu1 %v2159_v49 }
 0x25c   :  { %909 = vmatprep.subr.bf16.mxu0 %v2166_v50  ;;  %950 = vmatprep.subr.bf16.mxu1 %v2171_v51 }
 0x25f   :  { %910 = vmatpush1.bf16.msra.mxu0 %v2178_v52  ;;  %951 = vmatpush1.bf16.msra.mxu1 %v2183_v53 }
 0x260   :  { %911 = vmatprep.subr.bf16.mxu0 %v2190_v54  ;;  %952 = vmatprep.subr.bf16.mxu1 %v2195_v55 }
 0x263   :  { %912 = vmatpush1.bf16.msra.mxu0 %v2202_v56  ;;  %953 = vmatpush1.bf16.msra.mxu1 %v2207_v57 }
 0x264   :  { %913 = vmatprep.subr.bf16.mxu0 %v2214_v58  ;;  %954 = vmatprep.subr.bf16.mxu1 %v2219_v59 }
 0x267   :  { %914 = vmatpush1.bf16.msra.mxu0 %v2226_v60  ;;  %955 = vmatpush1.bf16.msra.mxu1 %v2231_v61 }
 0x268   :  { %915 = vmatprep.subr.bf16.mxu0 %v2238_v62  ;;  %956 = vmatprep.subr.bf16.mxu1 %v2243_v63 }
 0x26b   :  { %916 = vmatpush1.bf16.msra.mxu0 %v2250_v0  ;;  %957 = vmatpush1.bf16.msra.mxu1 %v2255_v2 }
 0x26c   :  { %1030 = vmatprep.subr.bf16.mxu0 %v2067_v33  ;;  %1071 = vmatprep.subr.bf16.mxu1 %v2072_v34 }
 0x321   :  { %v806_v14 = vpop.f32.mrb[12].mxu0  ;;  %v847_v31 = vpop.f32.mrb[12].mxu1 }
 0x322   :  { %v858_v35 = vrot.slane %v806_v14, 4  ;;  %v808_v29 = vpop.f32.mrb[13].mxu0  ;;  %v849_v16 = vpop.f32.mrb[13].mxu1  ;;  %v860_v10 = vrot.slane %v847_v31, 4  ;;  %v890_v31 = vrot.slane %v2364_v21, 6 }
 0x323   :  { %v859_v32 = vrot.slane %v808_v29, 4  ;;  %v810_v3 = vpop.f32.mrb[14].mxu0  ;;  %v851_v4 = vpop.f32.mrb[14].mxu1  ;;  %v861_v18 = vrot.slane %v849_v16, 4 }
 0x324   :  { %v866_v5 = vadd.f32 %v858_v35, %v2310_v26  ;;  %v811_v7 = vpop.f32.mrb[15].mxu0  ;;  %v852_v8 = vpop.f32.mrb[15].mxu1  ;;  %v868_v19 = vadd.f32 %v860_v10, %v2316_v9 }
 0x325   :  { %v867_v15 = vadd.f32 %v859_v32, %v2312_v27  ;;  %v869_v23 = vadd.f32 %v861_v18, %v2319_v12 }
 0x326   :  { %v1641_v6 = vmul.f32 -1.442695, %v866_v5  ;;  %v1643_v28 = vmul.f32 -1.442695, %v868_v19 }
 0x327   :  { %v1642_v17 = vmul.f32 -1.442695, %v867_v15 }
 0x328   :  { %1792 = vpow2.f32 %v1641_v6 }
 0x329   :  { %1794 = vpow2.f32 %v1642_v17 }
 0x32a   :  { %1796 = vtanh.f32 %v869_v23 }
 0x32b   :  { %1798 = vpow2.f32 %v1643_v28 }
 0x332   :  { %v1793_v30 = vpop.eup %1792 }
 0x333   :  { %v879_v11 = vadd.f32 1.0, %v1793_v30  ;;  %v1795_v13 = vpop.eup %1794 }
 0x334   :  { %v880_v14 = vadd.f32 1.0, %v1795_v13  ;;  %v1797_v35 = vpop.eup %1796 }
 0x335   :  { %1800 = vrcp.f32 %v879_v11  ;;  %v1799_v29 = vpop.eup %1798 }
 0x336   :  { %1802 = vrcp.f32 %v880_v14  ;;  %v881_v4 = vadd.f32 1.0, %v1799_v29 }
 0x338   :  { %1804 = vrcp.f32 %v881_v4 }
 0x33f   :  { %v1801_v32 = vpop.eup %1800 }
 0x340   :  { %v893_v3 = vmul.f32 %v1801_v32, %v1797_v35  ;;  %v1803_v16 = vpop.eup %1802 }
 0x341   :  { %v892_v5 = vmul.f32 %v1803_v16, %v890_v31 }
 0x342   :  { %v1805_v8 = vpop.eup %1804 }
 0x343   :  { %v2406_v7 = vadd.f32 %v893_v3, %v892_v5 }
 0x345   :  { %1806 = vtanh.f32 %v2406_v7 }
 0x34f   :  { %v1807_v15 = vpop.eup %1806 }
 0x350   :  { %v896_v6 = vmul.f32 %v1807_v15, %v1805_v8 }
 0x352   :  { %v897_v17 = vpack.c.bf16 %v896_v6, %v896_v6 }
 0x354   :  { %v899_v10 = vrot.slane %v897_v17, 2 }
 0x356   :  { %934 = vmatmul.mubr.bf16.vlgmr.msra.gmra.mrb[16].mxu0 %v899_v10  ;;  %975 = vmatmul.mubr.bf16.vlgmr.msra.gmra.mrb[16].mxu1 %v899_v10 }
 0x357   :  { %1031 = vmatpush1.bf16.msra.mxu0 %v2080_v36  ;;  %1072 = vmatpush1.bf16.msra.mxu1 %v2085_v37 }
 0x358   :  { %1032 = vmatprep.subr.bf16.mxu0 %v2090_v38  ;;  %1073 = vmatprep.subr.bf16.mxu1 %v2097_v39 }
 0x359   :  { %1062 = vmatprep.mubr.bf16.mxu0 %v1920_v1  ;;  %1103 = vmatprep.mubr.bf16.mxu1 %v1920_v1 }
 0x35b   :  { %1033 = vmatpush1.bf16.msra.mxu0 %v2102_v40  ;;  %1074 = vmatpush1.bf16.msra.mxu1 %v2109_v41 }
 0x35c   :  { %1034 = vmatprep.subr.bf16.mxu0 %v2116_v42  ;;  %1075 = vmatprep.subr.bf16.mxu1 %v2121_v43 }
 0x35f   :  { %1035 = vmatpush1.bf16.msra.mxu0 %v2130_v44  ;;  %1076 = vmatpush1.bf16.msra.mxu1 %v2135_v45 }
 0x360   :  { %1036 = vmatprep.subr.bf16.mxu0 %v2140_v46  ;;  %1077 = vmatprep.subr.bf16.mxu1 %v2147_v47 }
 0x363   :  { %1037 = vmatpush1.bf16.msra.mxu0 %v2154_v48  ;;  %1078 = vmatpush1.bf16.msra.mxu1 %v2159_v49 }
 0x364   :  { %1038 = vmatprep.subr.bf16.mxu0 %v2166_v50  ;;  %1079 = vmatprep.subr.bf16.mxu1 %v2171_v51 }
 0x367   :  { %1039 = vmatpush1.bf16.msra.mxu0 %v2178_v52  ;;  %1080 = vmatpush1.bf16.msra.mxu1 %v2183_v53 }
 0x368   :  { %1040 = vmatprep.subr.bf16.mxu0 %v2190_v54  ;;  %1081 = vmatprep.subr.bf16.mxu1 %v2195_v55 }
 0x36b   :  { %1041 = vmatpush1.bf16.msra.mxu0 %v2202_v56  ;;  %1082 = vmatpush1.bf16.msra.mxu1 %v2207_v57 }
 0x36c   :  { %1042 = vmatprep.subr.bf16.mxu0 %v2214_v58  ;;  %1083 = vmatprep.subr.bf16.mxu1 %v2219_v59 }
 0x36f   :  { %1043 = vmatpush1.bf16.msra.mxu0 %v2226_v60  ;;  %1084 = vmatpush1.bf16.msra.mxu1 %v2231_v61 }
 0x370   :  { %1044 = vmatprep.subr.bf16.mxu0 %v2238_v62  ;;  %1085 = vmatprep.subr.bf16.mxu1 %v2243_v63 }
 0x373   :  { %1045 = vmatpush1.bf16.msra.mxu0 %v2250_v0  ;;  %1086 = vmatpush1.bf16.msra.mxu1 %v2255_v2 }
 0x374   :  { %1144 = vmatprep.subr.bf16.mxu0 %v2067_v33  ;;  %1185 = vmatprep.subr.bf16.mxu1 %v2072_v34 }
 0x429   :  { %v935_v21 = vpop.f32.mrb[16].mxu0  ;;  %v976_v18 = vpop.f32.mrb[16].mxu1 }
 0x42a   :  { %v987_v19 = vrot.slane %v935_v21, 2  ;;  %v937_v23 = vpop.f32.mrb[17].mxu0  ;;  %v978_v28 = vpop.f32.mrb[17].mxu1  ;;  %v989_v16 = vrot.slane %v976_v18, 2  ;;  %v1019_v18 = vrot.slane %v2406_v7, 6 }
 0x42b   :  { %v988_v30 = vrot.slane %v937_v23, 2  ;;  %v939_v11 = vpop.f32.mrb[18].mxu0  ;;  %v980_v13 = vpop.f32.mrb[18].mxu1  ;;  %v990_v4 = vrot.slane %v978_v28, 2 }
 0x42c   :  { %v995_v14 = vadd.f32 %v987_v19, %v2310_v26  ;;  %v940_v35 = vpop.f32.mrb[19].mxu0  ;;  %v981_v29 = vpop.f32.mrb[19].mxu1  ;;  %v997_v5 = vadd.f32 %v989_v16, %v2316_v9 }
 0x42d   :  { %v996_v32 = vadd.f32 %v988_v30, %v2312_v27  ;;  %v998_v8 = vadd.f32 %v990_v4, %v2319_v12 }
 0x42e   :  { %v1644_v31 = vmul.f32 -1.442695, %v995_v14  ;;  %v1646_v15 = vmul.f32 -1.442695, %v997_v5 }
 0x42f   :  { %v1645_v3 = vmul.f32 -1.442695, %v996_v32 }
 0x430   :  { %1808 = vpow2.f32 %v1644_v31 }
 0x431   :  { %1810 = vpow2.f32 %v1645_v3 }
 0x432   :  { %1812 = vtanh.f32 %v998_v8 }
 0x433   :  { %1814 = vpow2.f32 %v1646_v15 }
 0x43a   :  { %v1809_v6 = vpop.eup %1808 }
 0x43b   :  { %v1008_v17 = vadd.f32 1.0, %v1809_v6  ;;  %v1811_v10 = vpop.eup %1810 }
 0x43c   :  { %v1009_v26 = vadd.f32 1.0, %v1811_v10  ;;  %v1813_v27 = vpop.eup %1812 }
 0x43d   :  { %1816 = vrcp.f32 %v1008_v17  ;;  %v1815_v21 = vpop.eup %1814 }
 0x43e   :  { %1818 = vrcp.f32 %v1009_v26  ;;  %v1010_v30 = vadd.f32 1.0, %v1815_v21 }
 0x440   :  { %1820 = vrcp.f32 %v1010_v30 }
 0x447   :  { %v1817_v19 = vpop.eup %1816 }
 0x448   :  { %v1022_v23 = vmul.f32 %v1817_v19, %v1813_v27  ;;  %v1819_v28 = vpop.eup %1818 }
 0x449   :  { %v1021_v9 = vmul.f32 %v1819_v28, %v1019_v18 }
 0x44a   :  { %v1821_v12 = vpop.eup %1820 }
 0x44b   :  { %v2448_v11 = vadd.f32 %v1022_v23, %v1021_v9 }
 0x44d   :  { %1822 = vtanh.f32 %v2448_v11  ;;  %v1136_v9 = vrot.slane %v2448_v11, 6 }
 0x457   :  { %v1823_v13 = vpop.eup %1822 }
 0x458   :  { %v1025_v14 = vmul.f32 %v1823_v13, %v1821_v12 }
 0x45a   :  { %v1026_v35 = vpack.c.bf16 %v1025_v14, %v1025_v14 }
 0x45c   :  { %v1028_v29 = vrot.slane %v1026_v35, 3 }
 0x45e   :  { %1063 = vmatmul.mubr.bf16.vlgmr.msra.gmra.mrb[20].mxu0 %v1028_v29  ;;  %1104 = vmatmul.mubr.bf16.vlgmr.msra.gmra.mrb[20].mxu1 %v1028_v29 }
 0x45f   :  { %1145 = vmatpush1.bf16.msra.mxu0 %v2080_v36  ;;  %1186 = vmatpush1.bf16.msra.mxu1 %v2085_v37 }
 0x460   :  { %1146 = vmatprep.subr.bf16.mxu0 %v2090_v38  ;;  %1187 = vmatprep.subr.bf16.mxu1 %v2097_v39 }
 0x461   :  { %1176 = vmatprep.mubr.bf16.mxu0 %v1920_v1  ;;  %1217 = vmatprep.mubr.bf16.mxu1 %v1920_v1 }
 0x463   :  { %1147 = vmatpush1.bf16.msra.mxu0 %v2102_v40  ;;  %1188 = vmatpush1.bf16.msra.mxu1 %v2109_v41 }
 0x464   :  { %1148 = vmatprep.subr.bf16.mxu0 %v2116_v42  ;;  %1189 = vmatprep.subr.bf16.mxu1 %v2121_v43 }
 0x467   :  { %1149 = vmatpush1.bf16.msra.mxu0 %v2130_v44  ;;  %1190 = vmatpush1.bf16.msra.mxu1 %v2135_v45 }
 0x468   :  { %1150 = vmatprep.subr.bf16.mxu0 %v2140_v46  ;;  %1191 = vmatprep.subr.bf16.mxu1 %v2147_v47 }
 0x46b   :  { %1151 = vmatpush1.bf16.msra.mxu0 %v2154_v48  ;;  %1192 = vmatpush1.bf16.msra.mxu1 %v2159_v49 }
 0x46c   :  { %1152 = vmatprep.subr.bf16.mxu0 %v2166_v50  ;;  %1193 = vmatprep.subr.bf16.mxu1 %v2171_v51 }
 0x46f   :  { %1153 = vmatpush1.bf16.msra.mxu0 %v2178_v52  ;;  %1194 = vmatpush1.bf16.msra.mxu1 %v2183_v53 }
 0x470   :  { %1154 = vmatprep.subr.bf16.mxu0 %v2190_v54  ;;  %1195 = vmatprep.subr.bf16.mxu1 %v2195_v55 }
 0x473   :  { %1155 = vmatpush1.bf16.msra.mxu0 %v2202_v56  ;;  %1196 = vmatpush1.bf16.msra.mxu1 %v2207_v57 }
 0x474   :  { %1156 = vmatprep.subr.bf16.mxu0 %v2214_v58  ;;  %1197 = vmatprep.subr.bf16.mxu1 %v2219_v59 }
 0x477   :  { %1157 = vmatpush1.bf16.msra.mxu0 %v2226_v60  ;;  %1198 = vmatpush1.bf16.msra.mxu1 %v2231_v61 }
 0x478   :  { %1158 = vmatprep.subr.bf16.mxu0 %v2238_v62  ;;  %1199 = vmatprep.subr.bf16.mxu1 %v2243_v63 }
 0x47b   :  { %1159 = vmatpush1.bf16.msra.mxu0 %v2250_v0  ;;  %1200 = vmatpush1.bf16.msra.mxu1 %v2255_v2 }
 0x47c   :  { %1273 = vmatprep.subr.bf16.mxu0 %v2067_v33  ;;  %1314 = vmatprep.subr.bf16.mxu1 %v2072_v34 }
 0x531   :  { %v1064_v7 = vpop.f32.mrb[20].mxu0  ;;  %v1105_v32 = vpop.f32.mrb[20].mxu1 }
 0x532   :  { %v1112_v31 = vadd.f32 %v1064_v7, %v2302_v20  ;;  %v1066_v3 = vpop.f32.mrb[21].mxu0  ;;  %v1107_v16 = vpop.f32.mrb[21].mxu1  ;;  %v1114_v33 = vadd.f32 %v1105_v32, %v2304_v22 }
 0x533   :  { %v1113_v4 = vadd.f32 %v1066_v3, %v2306_v24  ;;  %v1068_v5 = vpop.f32.mrb[22].mxu0  ;;  %v1109_v8 = vpop.f32.mrb[22].mxu1  ;;  %v1115_v34 = vadd.f32 %v1107_v16, %v2308_v25 }
 0x534   :  { %v1647_v15 = vmul.f32 -1.442695, %v1112_v31  ;;  %v1069_v6 = vpop.f32.mrb[23].mxu0  ;;  %v1110_v17 = vpop.f32.mrb[23].mxu1  ;;  %v1649_v26 = vmul.f32 -1.442695, %v1114_v33 }
 0x535   :  { %v1648_v10 = vmul.f32 -1.442695, %v1113_v4  ;;  %v1890_v33 = vld [vmem:[%s2657_s3] ss:$16 sps:$4 sm:$0xff]  }
 0x536   :  { %1824 = vpow2.f32 %v1647_v15 }
 0x537   :  { %1826 = vpow2.f32 %v1648_v10 }
 0x538   :  { %1828 = vtanh.f32 %v1115_v34  ;;  %v1891_v34 = vld [vmem:[%s2657_s3 + $0x8] ss:$16 sps:$4 sm:$0xff]  }
 0x539   :  { %1830 = vpow2.f32 %v1649_v26  ;;  %v1892_v26 = vld [vmem:[%s2657_s3 + $0x24] ss:$16 sps:$4 sm:$0xff]  }
 0x540   :  { %v1825_v27 = vpop.eup %1824 }
 0x541   :  { %v1125_v21 = vadd.f32 1.0, %v1825_v27  ;;  %v1827_v19 = vpop.eup %1826  ;;  %v1893_v27 = vld [vmem:[%s2657_s3 + $0x2c] ss:$16 sps:$4 sm:$0xff]  }
 0x542   :  { %v1126_v18 = vadd.f32 1.0, %v1827_v19  ;;  %v1829_v23 = vpop.eup %1828  ;;  %v1895_v19 = vld [vmem:[%s2657_s3 + $0x28] ss:$16 sps:$4 sm:$0xff]  }
 0x543   :  { %1832 = vrcp.f32 %v1125_v21  ;;  %v1831_v28 = vpop.eup %1830  ;;  %v1894_v21 = vld [vmem:[%s2657_s3 + $0x20] ss:$16 sps:$4 sm:$0xff]  }
 0x544   :  { %1834 = vrcp.f32 %v1126_v18  ;;  %v1127_v14 = vadd.f32 1.0, %v1831_v28  ;;  %v1896_v18 = vld [vmem:[%s2657_s3 + $0x44] ss:$16 sps:$4 sm:$0xff]   ;;  %v1899_v28 = vld [vmem:[%s2657_s3 + $0x48] ss:$16 sps:$4 sm:$0xff]  }
 0x546   :  { %1836 = vrcp.f32 %v1127_v14  ;;  %v1904_v14 = vld [vmem:[%s2657_s3 + $0x84] ss:$16 sps:$4 sm:$0xff]  }
 0x54d   :  { %v1833_v30 = vpop.eup %1832 }
 0x54e   :  { %v1139_v12 = vmul.f32 %v1833_v30, %v1829_v23  ;;  %v1835_v13 = vpop.eup %1834  ;;  %v1897_v23 = vld [vmem:[%s2657_s3 + $0x4c] ss:$16 sps:$4 sm:$0xff]   ;;  %v1900_v30 = vld [vmem:[%s2657_s3 + $0x64] ss:$16 sps:$4 sm:$0xff]  }
 0x54f   :  { %v1138_v35 = vmul.f32 %v1835_v13, %v1136_v9  ;;  %v1901_v9 = vld [vmem:[%s2657_s3 + $0x6c] ss:$16 sps:$4 sm:$0xff]   ;;  %v1903_v13 = vld [vmem:[%s2657_s3 + $0x68] ss:$16 sps:$4 sm:$0xff]  }
 0x550   :  { %v1837_v7 = vpop.eup %1836 }
 0x551   :  { %v2490_v29 = vadd.f32 %v1139_v12, %v1138_v35  ;;  %v1902_v12 = vld [vmem:[%s2657_s3 + $0x60] ss:$16 sps:$4 sm:$0xff]   ;;  %v1905_v35 = vld [vmem:[%s2657_s3 + $0x8c] ss:$16 sps:$4 sm:$0xff]  }
 0x553   :  { %1838 = vtanh.f32 %v2490_v29 }
 0x55d   :  { %v1839_v32 = vpop.eup %1838 }
 0x55e   :  { %v1142_v31 = vmul.f32 %v1839_v32, %v1837_v7  ;;  %v1907_v7 = vld [vmem:[%s2657_s3 + $0x88] ss:$16 sps:$4 sm:$0xff]   ;;  %v1908_v32 = vld [vmem:[%s2657_s3 + $0xa4] ss:$16 sps:$4 sm:$0xff]  }
 0x560   :  { %v1143_v3 = vpack.c.bf16 %v1142_v31, %v1142_v31  ;;  %v1909_v31 = vld [vmem:[%s2657_s3 + $0xac] ss:$16 sps:$4 sm:$0xff]  }
 0x562   :  { %1177 = vmatmul.mubr.bf16.vlgmr.msra.gmra.mrb[24].mxu0 %v1143_v3  ;;  %1218 = vmatmul.mubr.bf16.vlgmr.msra.gmra.mrb[24].mxu1 %v1143_v3  ;;  %v1910_v3 = vld [vmem:[%s2657_s3 + $0xa0] ss:$16 sps:$4 sm:$0xff]  }
 0x563   :  { %1274 = vmatpush1.bf16.msra.mxu0 %v2080_v36  ;;  %1315 = vmatpush1.bf16.msra.mxu1 %v2085_v37  ;;  %v1888_v36 = vld [vmem:[%s2657_s3 + $0x4] ss:$16 sps:$4 sm:$0xff]   ;;  %v1889_v37 = vld [vmem:[%s2657_s3 + $0xc] ss:$16 sps:$4 sm:$0xff]  }
 0x564   :  { %1275 = vmatprep.subr.bf16.mxu0 %v2090_v38  ;;  %1316 = vmatprep.subr.bf16.mxu1 %v2097_v39 }
 0x565   :  { %1305 = vmatprep.mubr.bf16.mxu0 %v1920_v1  ;;  %1346 = vmatprep.mubr.bf16.mxu1 %v1920_v1 }
 0x567   :  { %1276 = vmatpush1.bf16.msra.mxu0 %v2102_v40  ;;  %1317 = vmatpush1.bf16.msra.mxu1 %v2109_v41 }
 0x568   :  { %1277 = vmatprep.subr.bf16.mxu0 %v2116_v42  ;;  %1318 = vmatprep.subr.bf16.mxu1 %v2121_v43 }
 0x56b   :  { %1278 = vmatpush1.bf16.msra.mxu0 %v2130_v44  ;;  %1319 = vmatpush1.bf16.msra.mxu1 %v2135_v45 }
 0x56c   :  { %1279 = vmatprep.subr.bf16.mxu0 %v2140_v46  ;;  %1320 = vmatprep.subr.bf16.mxu1 %v2147_v47 }
 0x56f   :  { %1280 = vmatpush1.bf16.msra.mxu0 %v2154_v48  ;;  %1321 = vmatpush1.bf16.msra.mxu1 %v2159_v49 }
 0x570   :  { %1281 = vmatprep.subr.bf16.mxu0 %v2166_v50  ;;  %1322 = vmatprep.subr.bf16.mxu1 %v2171_v51 }
 0x573   :  { %1282 = vmatpush1.bf16.msra.mxu0 %v2178_v52  ;;  %1323 = vmatpush1.bf16.msra.mxu1 %v2183_v53 }
 0x574   :  { %1283 = vmatprep.subr.bf16.mxu0 %v2190_v54  ;;  %1324 = vmatprep.subr.bf16.mxu1 %v2195_v55 }
 0x577   :  { %1284 = vmatpush1.bf16.msra.mxu0 %v2202_v56  ;;  %1325 = vmatpush1.bf16.msra.mxu1 %v2207_v57 }
 0x578   :  { %1285 = vmatprep.subr.bf16.mxu0 %v2214_v58  ;;  %1326 = vmatprep.subr.bf16.mxu1 %v2219_v59 }
 0x57b   :  { %1286 = vmatpush1.bf16.msra.mxu0 %v2226_v60  ;;  %1327 = vmatpush1.bf16.msra.mxu1 %v2231_v61 }
 0x57c   :  { %1287 = vmatprep.subr.bf16.mxu0 %v2238_v62  ;;  %1328 = vmatprep.subr.bf16.mxu1 %v2243_v63 }
 0x57f   :  { %1288 = vmatpush1.bf16.msra.mxu0 %v2250_v0  ;;  %1329 = vmatpush1.bf16.msra.mxu1 %v2255_v2  ;;  %v1262_v0 = vrot.slane %v2490_v29, 6  ;;  %v1906_v29 = vld [vmem:[%s2657_s3 + $0x80] ss:$16 sps:$4 sm:$0xff]  }
 0x580   :  { %1402 = vmatprep.subr.bf16.mxu0 %v1888_v36  ;;  %1443 = vmatprep.subr.bf16.mxu1 %v1889_v37  ;;  %v1911_v36 = vld [vmem:[%s2657_s3 + $0xa8] ss:$16 sps:$4 sm:$0xff]   ;;  %v1912_v37 = vld [vmem:[%s2657_s3 + $0xc4] ss:$16 sps:$4 sm:$0xff]  }
 0x635   :  { %v1178_v38 = vpop.f32.mrb[24].mxu0  ;;  %v1219_v39 = vpop.f32.mrb[24].mxu1 }
 0x636   :  { %v1230_v40 = vrot.slane %v1178_v38, 6  ;;  %v1180_v41 = vpop.f32.mrb[25].mxu0  ;;  %v1221_v42 = vpop.f32.mrb[25].mxu1  ;;  %v1232_v52 = vrot.slane %v1219_v39, 6  ;;  %v1913_v38 = vld [vmem:[%s2657_s3 + $0xcc] ss:$16 sps:$4 sm:$0xff]  }
 0x637   :  { %v1231_v43 = vrot.slane %v1180_v41, 6  ;;  %v1182_v44 = vpop.f32.mrb[26].mxu0  ;;  %v1223_v45 = vpop.f32.mrb[26].mxu1  ;;  %v1233_v53 = vrot.slane %v1221_v42, 6  ;;  %v1914_v39 = vld [vmem:[%s2657_s3 + $0xc0] ss:$16 sps:$4 sm:$0xff]  }
 0x638   :  { %v1238_v46 = vadd.f32 %v1230_v40, %v2302_v20  ;;  %v1183_v47 = vpop.f32.mrb[27].mxu0  ;;  %v1224_v48 = vpop.f32.mrb[27].mxu1  ;;  %v1240_v54 = vadd.f32 %v1232_v52, %v2304_v22  ;;  %v1915_v40 = vld [vmem:[%s2657_s3 + $0xc8] ss:$16 sps:$4 sm:$0xff]   ;;  %v1916_v41 = vld [vmem:[%s2657_s3 + $0xe4] ss:$16 sps:$4 sm:$0xff]  }
 0x639   :  { %v1239_v49 = vadd.f32 %v1231_v43, %v2306_v24  ;;  %v1241_v55 = vadd.f32 %v1233_v53, %v2308_v25  ;;  %v1917_v42 = vld [vmem:[%s2657_s3 + $0xec] ss:$16 sps:$4 sm:$0xff]   ;;  %v1918_v43 = vld [vmem:[%s2657_s3 + $0xe0] ss:$16 sps:$4 sm:$0xff]   ;;  %v1919_v44 = vld [vmem:[%s2657_s3 + $0xe8] ss:$16 sps:$4 sm:$0xff]  }
 0x63a   :  { %v1650_v50 = vmul.f32 -1.442695, %v1238_v46  ;;  %v1652_v56 = vmul.f32 -1.442695, %v1240_v54 }
 0x63b   :  { %v1651_v51 = vmul.f32 -1.442695, %v1239_v49 }
 0x63c   :  { %1840 = vpow2.f32 %v1650_v50 }
 0x63d   :  { %1842 = vpow2.f32 %v1651_v51 }
 0x63e   :  { %1844 = vtanh.f32 %v1241_v55 }
 0x63f   :  { %1846 = vpow2.f32 %v1652_v56 }
 0x646   :  { %v1841_v57 = vpop.eup %1840 }
 0x647   :  { %v1251_v58 = vadd.f32 1.0, %v1841_v57  ;;  %v1843_v59 = vpop.eup %1842 }
 0x648   :  { %v1252_v60 = vadd.f32 1.0, %v1843_v59  ;;  %v1845_v61 = vpop.eup %1844 }
 0x649   :  { %1848 = vrcp.f32 %v1251_v58  ;;  %v1847_v62 = vpop.eup %1846 }
 0x64a   :  { %1850 = vrcp.f32 %v1252_v60  ;;  %v1253_v16 = vadd.f32 1.0, %v1847_v62 }
 0x64c   :  { %1852 = vrcp.f32 %v1253_v16 }
 0x653   :  { %v1849_v63 = vpop.eup %1848 }
 0x654   :  { %v1265_v2 = vmul.f32 %v1849_v63, %v1845_v61  ;;  %v1851_v11 = vpop.eup %1850 }
 0x655   :  { %v1264_v4 = vmul.f32 %v1851_v11, %v1262_v0 }
 0x656   :  { %v1853_v8 = vpop.eup %1852 }
 0x657   :  { %v2536_v5 = vadd.f32 %v1265_v2, %v1264_v4 }
 0x659   :  { %1854 = vtanh.f32 %v2536_v5 }
 0x663   :  { %v1855_v15 = vpop.eup %1854 }
 0x664   :  { %v1268_v6 = vmul.f32 %v1855_v15, %v1853_v8 }
 0x666   :  { %v1269_v17 = vpack.c.bf16 %v1268_v6, %v1268_v6  ;;  %v1391_v6 = vrot.slane %v2536_v5, 6  ;;  %v1660_v5 = vld [vmem:[%s2660_s6] ss:$0 sm:$0xff] }
 0x668   :  { %v1271_v10 = vrot.slane %v1269_v17, 1 }
 0x66a   :  { %1306 = vmatmul.mubr.bf16.vlgmr.msra.gmra.mrb[28].mxu0 %v1271_v10  ;;  %1347 = vmatmul.mubr.bf16.vlgmr.msra.gmra.mrb[28].mxu1 %v1271_v10 }
 0x66b   :  { %1403 = vmatpush1.bf16.msra.mxu0 %v1890_v33  ;;  %1444 = vmatpush1.bf16.msra.mxu1 %v1891_v34 }
 0x66c   :  { %1404 = vmatprep.subr.bf16.mxu0 %v1892_v26  ;;  %1445 = vmatprep.subr.bf16.mxu1 %v1893_v27 }
 0x66d   :  { %1434 = vmatprep.mubr.bf16.mxu0 %v1920_v1  ;;  %1475 = vmatprep.mubr.bf16.mxu1 %v1920_v1  ;;  %v1898_v1 = vld [vmem:[%s2657_s3 + $0x40] ss:$16 sps:$4 sm:$0xff]  }
 0x66f   :  { %1405 = vmatpush1.bf16.msra.mxu0 %v1894_v21  ;;  %1446 = vmatpush1.bf16.msra.mxu1 %v1895_v19 }
 0x670   :  { %1406 = vmatprep.subr.bf16.mxu0 %v1896_v18  ;;  %1447 = vmatprep.subr.bf16.mxu1 %v1897_v23 }
 0x673   :  { %1407 = vmatpush1.bf16.msra.mxu0 %v1898_v1  ;;  %1448 = vmatpush1.bf16.msra.mxu1 %v1899_v28  ;;  %v1539_v1 = vld [vmem:[%s2659_s1] sm:$0x3] }
 0x674   :  { %1408 = vmatprep.subr.bf16.mxu0 %v1900_v30  ;;  %1449 = vmatprep.subr.bf16.mxu1 %v1901_v9  ;;  %v1547_v28 = vmul.f32 %v1660_v5, %v1539_v1  ;;  %v13_v9 = vstv %s2661_s7 }
 0x675   :  { %14 = vst [vmem:[#allocation2] sm:$0x1] %v13_v9 }
 0x676   :  { %v1549_v30 = vsel %vm1548_vm0, %v1547_v28, 0.0 }
 0x677   :  { %1409 = vmatpush1.bf16.msra.mxu0 %v1902_v12  ;;  %1450 = vmatpush1.bf16.msra.mxu1 %v1903_v13 }
 0x678   :  { %1410 = vmatprep.subr.bf16.mxu0 %v1904_v14  ;;  %1451 = vmatprep.subr.bf16.mxu1 %v1905_v35 }
 0x679   :  { %1550 = vadd.xlane.f32.xlu0 %v1549_v30 }
 0x67b   :  { %1411 = vmatpush1.bf16.msra.mxu0 %v1906_v29  ;;  %1452 = vmatpush1.bf16.msra.mxu1 %v1907_v7 }
 0x67c   :  { %1412 = vmatprep.subr.bf16.mxu0 %v1908_v32  ;;  %1453 = vmatprep.subr.bf16.mxu1 %v1909_v31 }
 0x67f   :  { %1413 = vmatpush1.bf16.msra.mxu0 %v1910_v3  ;;  %1454 = vmatpush1.bf16.msra.mxu1 %v1911_v36 }
 0x680   :  { %1414 = vmatprep.subr.bf16.mxu0 %v1912_v37  ;;  %1455 = vmatprep.subr.bf16.mxu1 %v1913_v38 }
 0x683   :  { %1415 = vmatpush1.bf16.msra.mxu0 %v1914_v39  ;;  %1456 = vmatpush1.bf16.msra.mxu1 %v1915_v40 }
 0x684   :  { %1416 = vmatprep.subr.bf16.mxu0 %v1916_v41  ;;  %1457 = vmatprep.subr.bf16.mxu1 %v1917_v42 }
 0x687   :  { %1417 = vmatpush1.bf16.msra.mxu0 %v1918_v43  ;;  %1458 = vmatpush1.bf16.msra.mxu1 %v1919_v44 }
 0x73d   :  { %v1307_v45 = vpop.f32.mrb[28].mxu0  ;;  %v1348_v46 = vpop.f32.mrb[28].mxu1 }
 0x73e   :  { %v1359_v47 = vrot.slane %v1307_v45, 4  ;;  %v1309_v48 = vpop.f32.mrb[29].mxu0  ;;  %v1350_v49 = vpop.f32.mrb[29].mxu1  ;;  %v1361_v59 = vrot.slane %v1348_v46, 4 }
 0x73f   :  { %v1360_v50 = vrot.slane %v1309_v48, 4  ;;  %v1311_v51 = vpop.f32.mrb[30].mxu0  ;;  %v1352_v52 = vpop.f32.mrb[30].mxu1  ;;  %v1362_v60 = vrot.slane %v1350_v49, 4 }
 0x740   :  { %v1367_v53 = vadd.f32 %v1359_v47, %v2302_v20  ;;  %v1312_v54 = vpop.f32.mrb[31].mxu0  ;;  %v1353_v55 = vpop.f32.mrb[31].mxu1  ;;  %v1369_v61 = vadd.f32 %v1361_v59, %v2304_v22 }
 0x741   :  { %v1368_v56 = vadd.f32 %v1360_v50, %v2306_v24  ;;  %v1370_v62 = vadd.f32 %v1362_v60, %v2308_v25 }
 0x742   :  { %v1653_v57 = vmul.f32 -1.442695, %v1367_v53  ;;  %v1655_v63 = vmul.f32 -1.442695, %v1369_v61  ;;  %v1551_v61 = vpop.xlane.xlu0 %1550 }
 0x743   :  { %v1654_v58 = vmul.f32 -1.442695, %v1368_v56 }
 0x744   :  { %1856 = vpow2.f32 %v1653_v57  ;;  %v1659_v57 = vld [vmem:[%s2662_s5] ss:$0 sm:$0xff] }
 0x745   :  { %1858 = vpow2.f32 %v1654_v58 }
 0x746   :  { %1860 = vtanh.f32 %v1370_v62  ;;  %v1553_v62 = vrot.slane %v1551_v61, 2 }
 0x747   :  { %1862 = vpow2.f32 %v1655_v63  ;;  %v1661_v63 = vld [vmem:[#allocation2] ss:$0 sm:$0xff] }
 0x74e   :  { %v1857_v0 = vpop.eup %1856 }
 0x74f   :  { %v1380_v2 = vadd.f32 1.0, %v1857_v0  ;;  %v1859_v11 = vpop.eup %1858 }
 0x750   :  { %v1381_v16 = vadd.f32 1.0, %v1859_v11  ;;  %v1861_v4 = vpop.eup %1860 }
 0x751   :  { %1864 = vrcp.f32 %v1380_v2  ;;  %v1863_v8 = vpop.eup %1862 }
 0x752   :  { %1866 = vrcp.f32 %v1381_v16  ;;  %v1382_v33 = vadd.f32 1.0, %v1863_v8 }
 0x754   :  { %1868 = vrcp.f32 %v1382_v33 }
 0x75b   :  { %v1865_v15 = vpop.eup %1864 }
 0x75c   :  { %v1394_v17 = vmul.f32 %v1865_v15, %v1861_v4  ;;  %v1867_v10 = vpop.eup %1866 }
 0x75d   :  { %v1393_v34 = vmul.f32 %v1867_v10, %v1391_v6 }
 0x75e   :  { %v1869_v27 = vpop.eup %1868 }
 0x75f   :  { %v1395_v26 = vadd.f32 %v1394_v17, %v1393_v34 }
 0x761   :  { %1870 = vtanh.f32 %v1395_v26  ;;  %v1520_v51 = vrot.slane %v1395_v26, 6 }
 0x76b   :  { %v1871_v21 = vpop.eup %1870 }
 0x76c   :  { %v1397_v19 = vmul.f32 %v1871_v21, %v1869_v27 }
 0x76e   :  { %v1398_v18 = vpack.c.bf16 %v1397_v19, %v1397_v19 }
 0x770   :  { %v1400_v23 = vrot.slane %v1398_v18, 2 }
 0x772   :  { %1435 = vmatmul.mubr.bf16.vlgmr.msra.gmra.mrb[32].mxu0 %v1400_v23  ;;  %1476 = vmatmul.mubr.bf16.vlgmr.msra.gmra.mrb[32].mxu1 %v1400_v23 }
 0x845   :  { %v1436_v12 = vpop.f32.mrb[32].mxu0  ;;  %v1477_v13 = vpop.f32.mrb[32].mxu1 }
 0x846   :  { %v1488_v14 = vrot.slane %v1436_v12, 2  ;;  %v1438_v35 = vpop.f32.mrb[33].mxu0  ;;  %v1479_v29 = vpop.f32.mrb[33].mxu1  ;;  %v1490_v41 = vrot.slane %v1477_v13, 2 }
 0x847   :  { %v1489_v7 = vrot.slane %v1438_v35, 2  ;;  %v1440_v32 = vpop.f32.mrb[34].mxu0  ;;  %v1481_v31 = vpop.f32.mrb[34].mxu1  ;;  %v1491_v42 = vrot.slane %v1479_v29, 2 }
 0x848   :  { %v1496_v3 = vadd.f32 %v1488_v14, %v2302_v20  ;;  %v1441_v36 = vpop.f32.mrb[35].mxu0  ;;  %v1482_v37 = vpop.f32.mrb[35].mxu1  ;;  %v1498_v43 = vadd.f32 %v1490_v41, %v2304_v22 }
 0x849   :  { %v1497_v38 = vadd.f32 %v1489_v7, %v2306_v24  ;;  %v1499_v44 = vadd.f32 %v1491_v42, %v2308_v25 }
 0x84a   :  { %v1656_v39 = vmul.f32 -1.442695, %v1496_v3  ;;  %v1658_v45 = vmul.f32 -1.442695, %v1498_v43 }
 0x84b   :  { %v1657_v40 = vmul.f32 -1.442695, %v1497_v38 }
 0x84c   :  { %1872 = vpow2.f32 %v1656_v39 }
 0x84d   :  { %1874 = vpow2.f32 %v1657_v40 }
 0x84e   :  { %1876 = vtanh.f32 %v1499_v44 }
 0x84f   :  { %1878 = vpow2.f32 %v1658_v45 }
 0x856   :  { %v1873_v46 = vpop.eup %1872 }
 0x857   :  { %v1509_v47 = vadd.f32 1.0, %v1873_v46  ;;  %v1875_v48 = vpop.eup %1874 }
 0x858   :  { %v1510_v20 = vadd.f32 1.0, %v1875_v48  ;;  %v1877_v24 = vpop.eup %1876 }
 0x859   :  { %1880 = vrcp.f32 %v1509_v47  ;;  %v1879_v49 = vpop.eup %1878 }
 0x85a   :  { %1882 = vrcp.f32 %v1510_v20  ;;  %v1511_v54 = vadd.f32 1.0, %v1879_v49 }
 0x85c   :  { %1884 = vrcp.f32 %v1511_v54 }
 0x863   :  { %v1881_v50 = vpop.eup %1880 }
 0x864   :  { %v1523_v52 = vmul.f32 %v1881_v50, %v1877_v24  ;;  %v1883_v53 = vpop.eup %1882 }
 0x865   :  { %v1522_v55 = vmul.f32 %v1883_v53, %v1520_v51 }
 0x866   :  { %v1885_v25 = vpop.eup %1884 }
 0x867   :  { %v1524_v22 = vadd.f32 %v1523_v52, %v1522_v55 }
 0x869   :  { %1886 = vtanh.f32 %v1524_v22 }
 0x873   :  { %v1887_v56 = vpop.eup %1886 }
 0x874   :  { %v1526_v58 = vmul.f32 %v1887_v56, %v1885_v25 }
 0x876   :  { %v1534_v59 = vmul.f32 %v1659_v57, %v1526_v58 }
 0x878   :  { %v1536_v60 = vsel %vm1535_vm1, %v1534_v59, 0.0 }
 0x879   :  { %1537 = vadd.xlane.f32.xlu0 %v1536_v60 }
 0x906   :  { %v1538_v0 = vpop.xlane.xlu0 %1537 }
 0x907   :  { %v1555_v2 = vadd.f32 %v1553_v62, %v1538_v0 }
 0x909   :  { %v1563_v11 = vadd.f32 %v1661_v63, %v1555_v2 }
 0x90b   :  { %1565 = vst.msk [vmem:[%s2663_s8 - $0x6] sm:$0xc0] %vm1564_vm2, %v1563_v11 }

</bundles_post_ra>
